<compile_context>
chip_gen: v7x
topology: tpu7x:2x2x1
jax: 0.10.0
libtpu: 0.0.40
codegen_flags: <defaults>
</compile_context>

<pallas_src>
import math
from collections import namedtuple

import jax
import jax.numpy as jnp
from jax import lax
from jax.experimental import pallas as pl
from jax.experimental.pallas import tpu as pltpu


def _round_up(n, m):
    return ((n + m - 1) // m) * m


# --------------------------------------------------------------------------
# Model construction (mirrors the torch constructor)
# --------------------------------------------------------------------------
def build_layer_sizes(input_size, int_input_size, red_factor=2):
    """Mirror the torch constructor loop; returns (init, thru, encoder_layers).
    encoder_layers is a list of (in_features, out_features, has_relu)."""
    init = (input_size, int_input_size)
    thru = (int_input_size, input_size // 2)
    encoder = []
    i = input_size
    ct = 0
    while i // red_factor > 0:
        if i == input_size:
            pass  # init_layer / thru_layer handled separately (dropout=0.0)
        elif ct % 2 == 0 and i // (red_factor * 2) > 1:
            encoder.append((i, i // red_factor, True))
        elif i // red_factor == 1:
            encoder.append((i, i // red_factor, False))
        else:
            encoder.append((i, i // red_factor, True))
        i = i // red_factor
        ct += 1
    return init, thru, encoder


def init_linear(key, fan_in, fan_out, dtype=jnp.float32):
    """Xavier-uniform weight (torch.nn.init.xavier_uniform_) + default
    torch.nn.Linear uniform bias.  Weight kept in PyTorch [out, in] layout,
    bias stored as a column [out, 1] so it broadcasts over the lane axis."""
    kw, kb = jax.random.split(key)
    wb = math.sqrt(6.0 / (fan_in + fan_out))
    w = jax.random.uniform(kw, (fan_out, fan_in), dtype, -wb, wb)
    bb = 1.0 / math.sqrt(fan_in)
    b = jax.random.uniform(kb, (fan_out, 1), dtype, -bb, bb)
    return w, b


def build_fused_chain(params, encoder_relu):
    """params = [(W_init,b_init), (W_thru,b_thru), (W_e0,b_e0), ...] in
    [out,in] layout.  Folds thru_layer into encoder[0] (only the elementwise
    mask sits between init and thru, and thru has no nonlinearity).
    Returns (chain_params, chain_relu_flags)."""
    init_p, thru_p = params[0], params[1]
    enc = list(params[2:])
    if enc:
        (w_t, b_t), (w_e0, b_e0) = thru_p, enc[0]
        w_f = (w_e0 @ w_t).astype(jnp.float32)
        b_f = (w_e0 @ b_t + b_e0).astype(jnp.float32)
        chain = [init_p, (w_f, b_f)] + enc[1:]
        relu = [False] + list(encoder_relu)
    else:
        chain = [init_p, thru_p]
        relu = [False, False]
    return chain, relu


# --------------------------------------------------------------------------
# Constant packing (one bf16 slab + one f32 slab, VMEM-resident)
# --------------------------------------------------------------------------
LayerMeta = namedtuple("LayerMeta", ["is_mxu", "w_off", "b_off", "out", "kin"])


def _is_mxu_layer(layer_idx, fan_in, vpu_k_threshold):
    # Layer 0 always runs on the MXU: it contracts the batch-major streamed x
    # directly (A @ B.T), which is what lets us drop the host-side transpose.
    return layer_idx == 0 or fan_in > vpu_k_threshold


def pack_constants(chain_params, vpu_k_threshold):
    """Pack the tiny weights/biases into two slabs:
       * bf16 slab: MXU-layer weights (pre-cast on host) + identity matrix
         used to transpose the streamed mask on the MXU,
       * f32 slab : VPU-layer weights and all biases.
    Row offsets are padded to the sublane packing (16 rows bf16 / 8 rows f32)
    so in-kernel static slices land on layout boundaries."""
    bf_rows, f32_rows = [], []
    bf_off, f32_off = [0], [0]

    eye_n = chain_params[0][0].shape[0]  # init layer out = mask width
    mxu_k = [w.shape[1] for li, (w, _) in enumerate(chain_params)
             if _is_mxu_layer(li, w.shape[1], vpu_k_threshold)]
    vpu_k = [w.shape[1] for li, (w, _) in enumerate(chain_params)
             if not _is_mxu_layer(li, w.shape[1], vpu_k_threshold)]
    bf_cols = max(mxu_k + [eye_n])
    f32_cols = max(vpu_k + [1])

    def add_bf(a):
        r, c = a.shape
        rp = _round_up(r, 16)
        bf_rows.append(jnp.pad(jnp.asarray(a, jnp.bfloat16),
                               ((0, rp - r), (0, bf_cols - c))))
        off = bf_off[0]
        bf_off[0] += rp
        return off

    def add_f32(a):
        r, c = a.shape
        rp = _round_up(r, 8)
        f32_rows.append(jnp.pad(jnp.asarray(a, jnp.float32),
                                ((0, rp - r), (0, f32_cols - c))))
        off = f32_off[0]
        f32_off[0] += rp
        return off

    meta = []
    for li, (w, b) in enumerate(chain_params):
        out, kin = w.shape
        is_mxu = _is_mxu_layer(li, kin, vpu_k_threshold)
        w_off = add_bf(w) if is_mxu else add_f32(w)
        b_off = add_f32(b)
        meta.append(LayerMeta(is_mxu, w_off, b_off, out, kin))

    eye_off = add_bf(jnp.eye(eye_n, dtype=jnp.float32))
    bf_slab = jnp.concatenate(bf_rows, axis=0)
    f32_slab = jnp.concatenate(f32_rows, axis=0)
    return bf_slab, f32_slab, tuple(meta), eye_off, eye_n


# --------------------------------------------------------------------------
# Kernel
# --------------------------------------------------------------------------
def make_kernel(meta, eye_off, eye_n, relu_flags):
    """Fused kernel: init Linear -> mask mul -> (thru*enc0 folded) Linear+ReLU
    -> remaining encoder chain.  One batch tile per grid step; weights/biases
    live in two VMEM-resident slabs."""
    n_layers = len(meta)

    def kernel(x_ref, ints_ref, wbf_ref, cst_ref, out_ref):
        wbf = wbf_ref[...]        # bf16 slab (loaded once per step)
        cst = cst_ref[...]        # f32 slab

        # -- Layer 0 (init): MXU dot contracting x's feature dim directly;
        #    output [out0, bt] is feature-major / lane-dense. --
        m0 = meta[0]
        w0 = wbf[m0.w_off:m0.w_off + m0.out, 0:m0.kin]
        b0 = cst[m0.b_off:m0.b_off + m0.out, 0:1]
        h = lax.dot_general(w0, x_ref[...],
                            dimension_numbers=(((1,), (1,)), ((), ())),
                            preferred_element_type=jnp.float32)
        # PassThroughLayer: transpose the batch-major mask to feature-major
        # via a tiny identity matmul on the (near-idle) MXU — avoids a
        # lane-sparse VPU/XLU relayout and any host-side transpose.
        eye = wbf[eye_off:eye_off + eye_n, 0:eye_n]
        mask = lax.dot_general(eye, ints_ref[...],
                               dimension_numbers=(((1,), (1,)), ((), ())),
                               preferred_element_type=jnp.float32)
        h = (h + b0) * mask
        if relu_flags[0]:
            h = jnp.maximum(h, 0.0)

        # -- Remaining chain: feature-major, lane-dense. --
        for li in range(1, n_layers):
            m = meta[li]
            b = cst[m.b_off:m.b_off + m.out, 0:1]
            if m.is_mxu:
                w = wbf[m.w_off:m.w_off + m.out, 0:m.kin]   # pre-cast bf16
                h = jnp.dot(w, h.astype(jnp.bfloat16),
                            preferred_element_type=jnp.float32) + b
            else:
                # Tiny contraction: VPU broadcast multiply-adds, skip the MXU.
                w = cst[m.w_off:m.w_off + m.out, 0:m.kin]
                acc = w[:, 0:1] * h[0:1, :]
                for k in range(1, m.kin):
                    acc = acc + w[:, k:k + 1] * h[k:k + 1, :]
                h = acc + b
            if relu_flags[li]:
                h = jnp.maximum(h, 0.0)

        out_ref[...] = h.astype(out_ref.dtype)

    return kernel


# --------------------------------------------------------------------------
# Wrapper
# --------------------------------------------------------------------------
def _default_batch_tile(batch):
    """1 fat grid step on single-TC chips (v5e/v6e) to amortize the ~0.35 us
    per-step overhead; >=2 steps on v7x so the 'parallel' batch axis is
    sharded across both TensorCores.  The double-buffered bf16 tile is
    <0.5 MiB, so VMEM is irrelevant on every generation (incl. v7x 64 MiB)."""
    b128 = _round_up(batch, 128)
    cap = 2048
    try:
        kind = jax.devices()[0].device_kind.lower()
    except Exception:
        kind = ""
    multi_tc = "v7" in kind
    if multi_tc and b128 >= 256:
        bt = _round_up(-(-b128 // 2), 128)   # ~2 grid steps
    else:
        bt = b128                            # single fat step when it fits
    return max(128, min(cap, bt))


def lin_model_pass_through(x, ints, chain_params, chain_relu, *,
                           batch_tile=None, vpu_k_threshold=8):
    """x: [batch, input_size], ints: [batch, int_input_size] (batch-major, as
    in the torch module).  Returns [batch, out_features] float32."""
    batch, input_size = x.shape
    int_size = ints.shape[1]
    out_features = chain_params[-1][0].shape[0]

    if batch_tile is None:
        bt = _default_batch_tile(batch)
    else:
        bt = max(128, _round_up(min(batch_tile, _round_up(batch, 128)), 128))
    padded = _round_up(batch, bt)
    pad = padded - batch

    # Pre-cast streamed activations to bf16 on the host (half the DMA bytes,
    # no in-kernel converts).  No transpose: kernel consumes batch-major tiles.
    x_b = x.astype(jnp.bfloat16)
    ints_b = ints.astype(jnp.bfloat16)
    if pad:
        x_b = jnp.pad(x_b, ((0, pad), (0, 0)))
        ints_b = jnp.pad(ints_b, ((0, pad), (0, 0)))

    wbf_slab, f32_slab, meta, eye_off, eye_n = pack_constants(
        chain_params, vpu_k_threshold)
    kernel = make_kernel(meta, eye_off, eye_n, tuple(chain_relu))
    grid = (padded // bt,)

    out_t = pl.pallas_call(
        kernel,
        out_shape=jax.ShapeDtypeStruct((out_features, padded), jnp.float32),
        grid=grid,
        in_specs=[
            pl.BlockSpec((bt, input_size), lambda i: (i, 0)),   # x tile
            pl.BlockSpec((bt, int_size), lambda i: (i, 0)),     # ints tile
            pl.BlockSpec(wbf_slab.shape, lambda i: (0, 0)),     # bf16 slab
            pl.BlockSpec(f32_slab.shape, lambda i: (0, 0)),     # f32 slab
        ],
        out_specs=pl.BlockSpec((out_features, bt), lambda i: (0, i)),
        compiler_params=pltpu.CompilerParams(
            dimension_semantics=("parallel",)),   # both TCs on v7x
    )(x_b, ints_b, wbf_slab, f32_slab)

    out_bm = out_t[:, :batch] if pad else out_t
    if out_features == 1:
        # [1, batch] -> [batch, 1] is a pure reshape, not a transpose copy.
        return out_bm.reshape(batch, 1)
    return out_bm.T


# --------------------------------------------------------------------------
# References
# --------------------------------------------------------------------------
def reference_fused(x, ints, chain_params, chain_relu, vpu_k_threshold=8):
    """Plain-JAX reference with the kernel's exact math / precision policy
    (bf16 MXU inputs, f32 accumulation, same MXU/VPU split, thru fold)."""
    w0, b0 = chain_params[0]
    h = jnp.dot(w0.astype(jnp.bfloat16), x.astype(jnp.bfloat16).T,
                preferred_element_type=jnp.float32)
    mask = ints.astype(jnp.bfloat16).astype(jnp.float32).T
    h = (h + b0) * mask
    if chain_relu[0]:
        h = jnp.maximum(h, 0.0)
    for li in range(1, len(chain_params)):
        w, b = chain_params[li]
        if _is_mxu_layer(li, w.shape[1], vpu_k_threshold):
            h = jnp.dot(w.astype(jnp.bfloat16), h.astype(jnp.bfloat16),
                        preferred_element_type=jnp.float32) + b
        else:
            h = jnp.dot(w.astype(jnp.float32), h,
                        preferred_element_type=jnp.float32) + b
        if chain_relu[li]:
            h = jnp.maximum(h, 0.0)
    return h.T


def reference_f32(x, ints, params, encoder_relu):
    """Unfused, batch-major f32 reference mirroring the torch forward
    (no thru/encoder[0] fold, no bf16) for a looser semantic check."""
    (w_i, b_i), (w_t, b_t) = params[0], params[1]
    h = x @ w_i.T + b_i.T
    h = h * ints
    h = h @ w_t.T + b_t.T
    for (w, b), r in zip(params[2:], encoder_relu):
        h = h @ w.T + b.T
        if r:
            h = jnp.maximum(h, 0.0)
    return h


# --------------------------------------------------------------------------
# Demo / self-test
# --------------------------------------------------------------------------
if __name__ == "__main__":
    input_size = 32
    int_input_size = 16
    batch = 1024

    init_lw, thru_lw, encoder_lw = build_layer_sizes(input_size, int_input_size)

    key = jax.random.PRNGKey(0)
    keys = jax.random.split(key, 4 + len(encoder_lw))

    x = jax.random.normal(keys[0], (batch, input_size), jnp.float32)
    # mask / "ints" input for the pass-through layer, same shape as lin_pass
    ints = jax.random.bernoulli(keys[1], 0.5,
                                (batch, int_input_size)).astype(jnp.float32)

    params = [init_linear(keys[2], *init_lw),          # init_layer
              init_linear(keys[3], *thru_lw)]          # thru_layer
    encoder_relu = []
    for idx, (fi, fo, relu) in enumerate(encoder_lw):  # encoder chain
        params.append(init_linear(keys[4 + idx], fi, fo))
        encoder_relu.append(relu)

    chain_params, chain_relu = build_fused_chain(params, encoder_relu)
    out_features = chain_params[-1][0].shape[0]

    out = lin_model_pass_through(x, ints, chain_params, chain_relu)
    out = jax.block_until_ready(out)

    assert out.shape == (batch, out_features)

    # Tight check vs a plain-JAX reference with identical math & precision.
    ref = reference_fused(x, ints, chain_params, chain_relu)
    assert jnp.allclose(out, ref, atol=1e-3, rtol=1e-3), \
        float(jnp.max(jnp.abs(out - ref)))

    # Loose check vs the unfused f32 reference: bounds bf16-MXU + fold drift
    # (the torch spec is f64, so bit equality was never available on TPU).
    ref32 = reference_f32(x, ints, params, encoder_relu)
    assert jnp.allclose(out, ref32, atol=5e-2, rtol=5e-2), \
        float(jnp.max(jnp.abs(out - ref32)))

    print("KERNEL_OK")
</pallas_src>

<mosaic_0001>
module attributes {stable_mosaic.version = 11 : i64} {
  func.func @kernel(%arg0: i32, %arg1: memref<1024x32xbf16, #tpu.memory_space<vmem>>, %arg2: memref<1024x16xbf16, #tpu.memory_space<vmem>>, %arg3: memref<48x32xbf16, #tpu.memory_space<vmem>>, %arg4: memref<72x8xf32, #tpu.memory_space<vmem>>, %arg5: memref<1x1024xf32, #tpu.memory_space<vmem>>) attributes {dimension_semantics = [#tpu.dimension_semantics<parallel>], iteration_bounds = array<i64: 1>, scalar_prefetch = 0 : i64, scratch_operands = 0 : i64, tpu.core_type = #tpu.core_type<tc>, window_params = [{transform_indices = @transform_0, window_bounds = array<i64: 1024, 32>}, {transform_indices = @transform_1, window_bounds = array<i64: 1024, 16>}, {pipeline_mode = #tpu.pipeline_mode<synchronous>, transform_indices = @transform_2, window_bounds = array<i64: 48, 32>}, {pipeline_mode = #tpu.pipeline_mode<synchronous>, transform_indices = @transform_3, window_bounds = array<i64: 72, 8>}, {transform_indices = @transform_4, window_bounds = array<i64: 1, 1024>}]} {
    %c0 = arith.constant 0 : index
    %c0_0 = arith.constant 0 : index
    %0 = vector.load %arg3[%c0, %c0_0] : memref<48x32xbf16, #tpu.memory_space<vmem>>, vector<48x32xbf16>
    %c0_1 = arith.constant 0 : index
    %c0_2 = arith.constant 0 : index
    %1 = vector.load %arg4[%c0_1, %c0_2] : memref<72x8xf32, #tpu.memory_space<vmem>>, vector<72x8xf32>
    %2 = vector.extract_strided_slice %0 {offsets = [0, 0], sizes = [16, 32], strides = [1, 1]} : vector<48x32xbf16> to vector<16x32xbf16>
    %3 = vector.extract_strided_slice %1 {offsets = [0, 0], sizes = [16, 1], strides = [1, 1]} : vector<72x8xf32> to vector<16x1xf32>
    %c0_3 = arith.constant 0 : index
    %c0_4 = arith.constant 0 : index
    %4 = vector.load %arg1[%c0_3, %c0_4] : memref<1024x32xbf16, #tpu.memory_space<vmem>>, vector<1024x32xbf16>
    %cst = arith.constant dense<0.000000e+00> : vector<16x1024xf32>
    %5 = tpu.matmul %2, %4, %cst {dimension_numbers = #tpu.dot_dimension_numbers<[1], [1], [0], [0], [0, 0, 1, 0], [], []>} : vector<16x32xbf16>, vector<1024x32xbf16>, vector<16x1024xf32> -> vector<16x1024xf32>
    %6 = vector.extract_strided_slice %0 {offsets = [32, 0], sizes = [16, 16], strides = [1, 1]} : vector<48x32xbf16> to vector<16x16xbf16>
    %c0_5 = arith.constant 0 : index
    %c0_6 = arith.constant 0 : index
    %7 = vector.load %arg2[%c0_5, %c0_6] : memref<1024x16xbf16, #tpu.memory_space<vmem>>, vector<1024x16xbf16>
    %cst_7 = arith.constant dense<0.000000e+00> : vector<16x1024xf32>
    %8 = tpu.matmul %6, %7, %cst_7 {dimension_numbers = #tpu.dot_dimension_numbers<[1], [1], [0], [0], [0, 0, 1, 0], [], []>} : vector<16x16xbf16>, vector<1024x16xbf16>, vector<16x1024xf32> -> vector<16x1024xf32>
    %9 = vector.broadcast %3 : vector<16x1xf32> to vector<16x1024xf32>
    %10 = arith.addf %5, %9 : vector<16x1024xf32>
    %11 = arith.mulf %10, %8 : vector<16x1024xf32>
    %12 = vector.extract_strided_slice %1 {offsets = [16, 0], sizes = [8, 1], strides = [1, 1]} : vector<72x8xf32> to vector<8x1xf32>
    %13 = vector.extract_strided_slice %0 {offsets = [16, 0], sizes = [8, 16], strides = [1, 1]} : vector<48x32xbf16> to vector<8x16xbf16>
    %14 = arith.truncf %11 : vector<16x1024xf32> to vector<16x1024xbf16>
    %cst_8 = arith.constant dense<0.000000e+00> : vector<8x1024xf32>
    %15 = tpu.matmul %13, %14, %cst_8 {dimension_numbers = #tpu.dot_dimension_numbers<[1], [0], [0], [1], [0, 0, 1, 1], [], []>} : vector<8x16xbf16>, vector<16x1024xbf16>, vector<8x1024xf32> -> vector<8x1024xf32>
    %16 = vector.broadcast %12 : vector<8x1xf32> to vector<8x1024xf32>
    %17 = arith.addf %15, %16 : vector<8x1024xf32>
    %cst_9 = arith.constant 0.000000e+00 : f32
    %18 = vector.broadcast %cst_9 : f32 to vector<8x1024xf32>
    %19 = arith.maximumf %17, %18 : vector<8x1024xf32>
    %20 = vector.extract_strided_slice %1 {offsets = [32, 0], sizes = [4, 1], strides = [1, 1]} : vector<72x8xf32> to vector<4x1xf32>
    %21 = vector.extract_strided_slice %1 {offsets = [24, 0], sizes = [4, 8], strides = [1, 1]} : vector<72x8xf32> to vector<4x8xf32>
    %22 = vector.extract_strided_slice %21 {offsets = [0, 0], sizes = [4, 1], strides = [1, 1]} : vector<4x8xf32> to vector<4x1xf32>
    %23 = vector.extract_strided_slice %19 {offsets = [0, 0], sizes = [1, 1024], strides = [1, 1]} : vector<8x1024xf32> to vector<1x1024xf32>
    %24 = vector.broadcast %22 : vector<4x1xf32> to vector<4x1024xf32>
    %25 = vector.broadcast %23 : vector<1x1024xf32> to vector<4x1024xf32>
    %26 = arith.mulf %24, %25 : vector<4x1024xf32>
    %27 = vector.extract_strided_slice %21 {offsets = [0, 1], sizes = [4, 1], strides = [1, 1]} : vector<4x8xf32> to vector<4x1xf32>
    %28 = vector.extract_strided_slice %19 {offsets = [1, 0], sizes = [1, 1024], strides = [1, 1]} : vector<8x1024xf32> to vector<1x1024xf32>
    %29 = vector.broadcast %27 : vector<4x1xf32> to vector<4x1024xf32>
    %30 = vector.broadcast %28 : vector<1x1024xf32> to vector<4x1024xf32>
    %31 = arith.mulf %29, %30 : vector<4x1024xf32>
    %32 = arith.addf %26, %31 : vector<4x1024xf32>
    %33 = vector.extract_strided_slice %21 {offsets = [0, 2], sizes = [4, 1], strides = [1, 1]} : vector<4x8xf32> to vector<4x1xf32>
    %34 = vector.extract_strided_slice %19 {offsets = [2, 0], sizes = [1, 1024], strides = [1, 1]} : vector<8x1024xf32> to vector<1x1024xf32>
    %35 = vector.broadcast %33 : vector<4x1xf32> to vector<4x1024xf32>
    %36 = vector.broadcast %34 : vector<1x1024xf32> to vector<4x1024xf32>
    %37 = arith.mulf %35, %36 : vector<4x1024xf32>
    %38 = arith.addf %32, %37 : vector<4x1024xf32>
    %39 = vector.extract_strided_slice %21 {offsets = [0, 3], sizes = [4, 1], strides = [1, 1]} : vector<4x8xf32> to vector<4x1xf32>
    %40 = vector.extract_strided_slice %19 {offsets = [3, 0], sizes = [1, 1024], strides = [1, 1]} : vector<8x1024xf32> to vector<1x1024xf32>
    %41 = vector.broadcast %39 : vector<4x1xf32> to vector<4x1024xf32>
    %42 = vector.broadcast %40 : vector<1x1024xf32> to vector<4x1024xf32>
    %43 = arith.mulf %41, %42 : vector<4x1024xf32>
    %44 = arith.addf %38, %43 : vector<4x1024xf32>
    %45 = vector.extract_strided_slice %21 {offsets = [0, 4], sizes = [4, 1], strides = [1, 1]} : vector<4x8xf32> to vector<4x1xf32>
    %46 = vector.extract_strided_slice %19 {offsets = [4, 0], sizes = [1, 1024], strides = [1, 1]} : vector<8x1024xf32> to vector<1x1024xf32>
    %47 = vector.broadcast %45 : vector<4x1xf32> to vector<4x1024xf32>
    %48 = vector.broadcast %46 : vector<1x1024xf32> to vector<4x1024xf32>
    %49 = arith.mulf %47, %48 : vector<4x1024xf32>
    %50 = arith.addf %44, %49 : vector<4x1024xf32>
    %51 = vector.extract_strided_slice %21 {offsets = [0, 5], sizes = [4, 1], strides = [1, 1]} : vector<4x8xf32> to vector<4x1xf32>
    %52 = vector.extract_strided_slice %19 {offsets = [5, 0], sizes = [1, 1024], strides = [1, 1]} : vector<8x1024xf32> to vector<1x1024xf32>
    %53 = vector.broadcast %51 : vector<4x1xf32> to vector<4x1024xf32>
    %54 = vector.broadcast %52 : vector<1x1024xf32> to vector<4x1024xf32>
    %55 = arith.mulf %53, %54 : vector<4x1024xf32>
    %56 = arith.addf %50, %55 : vector<4x1024xf32>
    %57 = vector.extract_strided_slice %21 {offsets = [0, 6], sizes = [4, 1], strides = [1, 1]} : vector<4x8xf32> to vector<4x1xf32>
    %58 = vector.extract_strided_slice %19 {offsets = [6, 0], sizes = [1, 1024], strides = [1, 1]} : vector<8x1024xf32> to vector<1x1024xf32>
    %59 = vector.broadcast %57 : vector<4x1xf32> to vector<4x1024xf32>
    %60 = vector.broadcast %58 : vector<1x1024xf32> to vector<4x1024xf32>
    %61 = arith.mulf %59, %60 : vector<4x1024xf32>
    %62 = arith.addf %56, %61 : vector<4x1024xf32>
    %63 = vector.extract_strided_slice %21 {offsets = [0, 7], sizes = [4, 1], strides = [1, 1]} : vector<4x8xf32> to vector<4x1xf32>
    %64 = vector.extract_strided_slice %19 {offsets = [7, 0], sizes = [1, 1024], strides = [1, 1]} : vector<8x1024xf32> to vector<1x1024xf32>
    %65 = vector.broadcast %63 : vector<4x1xf32> to vector<4x1024xf32>
    %66 = vector.broadcast %64 : vector<1x1024xf32> to vector<4x1024xf32>
    %67 = arith.mulf %65, %66 : vector<4x1024xf32>
    %68 = arith.addf %62, %67 : vector<4x1024xf32>
    %69 = vector.broadcast %20 : vector<4x1xf32> to vector<4x1024xf32>
    %70 = arith.addf %68, %69 : vector<4x1024xf32>
    %cst_10 = arith.constant 0.000000e+00 : f32
    %71 = vector.broadcast %cst_10 : f32 to vector<4x1024xf32>
    %72 = arith.maximumf %70, %71 : vector<4x1024xf32>
    %73 = vector.extract_strided_slice %1 {offsets = [48, 0], sizes = [2, 1], strides = [1, 1]} : vector<72x8xf32> to vector<2x1xf32>
    %74 = vector.extract_strided_slice %1 {offsets = [40, 0], sizes = [2, 4], strides = [1, 1]} : vector<72x8xf32> to vector<2x4xf32>
    %75 = vector.extract_strided_slice %74 {offsets = [0, 0], sizes = [2, 1], strides = [1, 1]} : vector<2x4xf32> to vector<2x1xf32>
    %76 = vector.extract_strided_slice %72 {offsets = [0, 0], sizes = [1, 1024], strides = [1, 1]} : vector<4x1024xf32> to vector<1x1024xf32>
    %77 = vector.broadcast %75 : vector<2x1xf32> to vector<2x1024xf32>
    %78 = vector.broadcast %76 : vector<1x1024xf32> to vector<2x1024xf32>
    %79 = arith.mulf %77, %78 : vector<2x1024xf32>
    %80 = vector.extract_strided_slice %74 {offsets = [0, 1], sizes = [2, 1], strides = [1, 1]} : vector<2x4xf32> to vector<2x1xf32>
    %81 = vector.extract_strided_slice %72 {offsets = [1, 0], sizes = [1, 1024], strides = [1, 1]} : vector<4x1024xf32> to vector<1x1024xf32>
    %82 = vector.broadcast %80 : vector<2x1xf32> to vector<2x1024xf32>
    %83 = vector.broadcast %81 : vector<1x1024xf32> to vector<2x1024xf32>
    %84 = arith.mulf %82, %83 : vector<2x1024xf32>
    %85 = arith.addf %79, %84 : vector<2x1024xf32>
    %86 = vector.extract_strided_slice %74 {offsets = [0, 2], sizes = [2, 1], strides = [1, 1]} : vector<2x4xf32> to vector<2x1xf32>
    %87 = vector.extract_strided_slice %72 {offsets = [2, 0], sizes = [1, 1024], strides = [1, 1]} : vector<4x1024xf32> to vector<1x1024xf32>
    %88 = vector.broadcast %86 : vector<2x1xf32> to vector<2x1024xf32>
    %89 = vector.broadcast %87 : vector<1x1024xf32> to vector<2x1024xf32>
    %90 = arith.mulf %88, %89 : vector<2x1024xf32>
    %91 = arith.addf %85, %90 : vector<2x1024xf32>
    %92 = vector.extract_strided_slice %74 {offsets = [0, 3], sizes = [2, 1], strides = [1, 1]} : vector<2x4xf32> to vector<2x1xf32>
    %93 = vector.extract_strided_slice %72 {offsets = [3, 0], sizes = [1, 1024], strides = [1, 1]} : vector<4x1024xf32> to vector<1x1024xf32>
    %94 = vector.broadcast %92 : vector<2x1xf32> to vector<2x1024xf32>
    %95 = vector.broadcast %93 : vector<1x1024xf32> to vector<2x1024xf32>
    %96 = arith.mulf %94, %95 : vector<2x1024xf32>
    %97 = arith.addf %91, %96 : vector<2x1024xf32>
    %98 = vector.broadcast %73 : vector<2x1xf32> to vector<2x1024xf32>
    %99 = arith.addf %97, %98 : vector<2x1024xf32>
    %cst_11 = arith.constant 0.000000e+00 : f32
    %100 = vector.broadcast %cst_11 : f32 to vector<2x1024xf32>
    %101 = arith.maximumf %99, %100 : vector<2x1024xf32>
    %102 = vector.extract_strided_slice %1 {offsets = [64, 0], sizes = [1, 1], strides = [1, 1]} : vector<72x8xf32> to vector<1x1xf32>
    %103 = vector.extract_strided_slice %1 {offsets = [56, 0], sizes = [1, 2], strides = [1, 1]} : vector<72x8xf32> to vector<1x2xf32>
    %104 = vector.extract_strided_slice %103 {offsets = [0, 0], sizes = [1, 1], strides = [1, 1]} : vector<1x2xf32> to vector<1x1xf32>
    %105 = vector.extract_strided_slice %101 {offsets = [0, 0], sizes = [1, 1024], strides = [1, 1]} : vector<2x1024xf32> to vector<1x1024xf32>
    %106 = vector.broadcast %104 : vector<1x1xf32> to vector<1x1024xf32>
    %107 = arith.mulf %106, %105 : vector<1x1024xf32>
    %108 = vector.extract_strided_slice %103 {offsets = [0, 1], sizes = [1, 1], strides = [1, 1]} : vector<1x2xf32> to vector<1x1xf32>
    %109 = vector.extract_strided_slice %101 {offsets = [1, 0], sizes = [1, 1024], strides = [1, 1]} : vector<2x1024xf32> to vector<1x1024xf32>
    %110 = vector.broadcast %108 : vector<1x1xf32> to vector<1x1024xf32>
    %111 = arith.mulf %110, %109 : vector<1x1024xf32>
    %112 = arith.addf %107, %111 : vector<1x1024xf32>
    %113 = vector.broadcast %102 : vector<1x1xf32> to vector<1x1024xf32>
    %114 = arith.addf %112, %113 : vector<1x1024xf32>
    %c0_12 = arith.constant 0 : index
    %c0_13 = arith.constant 0 : index
    %115 = vector.load %arg5[%c0_12, %c0_13] : memref<1x1024xf32, #tpu.memory_space<vmem>>, vector<1x1024xf32>
    tpu.vector_store %arg5[%c0_12, %c0_13], %114 {strides = array<i32>} : memref<1x1024xf32, #tpu.memory_space<vmem>>, vector<1x1024xf32>,
    return
  }
  func.func @transform_0(%arg0: i32) -> (i32, i32) {
    %c0_i32 = arith.constant 0 : i32
    %c0_i32_0 = arith.constant 0 : i32
    return %arg0, %c0_i32 : i32, i32
  }
  func.func @transform_1(%arg0: i32) -> (i32, i32) {
    %c0_i32 = arith.constant 0 : i32
    %c0_i32_0 = arith.constant 0 : i32
    return %arg0, %c0_i32 : i32, i32
  }
  func.func @transform_2(%arg0: i32) -> (i32, i32) {
    %c0_i32 = arith.constant 0 : i32
    %c0_i32_0 = arith.constant 0 : i32
    %c0_i32_1 = arith.constant 0 : i32
    return %c0_i32, %c0_i32_0 : i32, i32
  }
  func.func @transform_3(%arg0: i32) -> (i32, i32) {
    %c0_i32 = arith.constant 0 : i32
    %c0_i32_0 = arith.constant 0 : i32
    %c0_i32_1 = arith.constant 0 : i32
    return %c0_i32, %c0_i32_0 : i32, i32
  }
  func.func @transform_4(%arg0: i32) -> (i32, i32) {
    %c0_i32 = arith.constant 0 : i32
    %c0_i32_0 = arith.constant 0 : i32
    return %c0_i32, %arg0 : i32, i32
  }
}

</mosaic_0001>

<bundles_post_ra>
// kernel: tpu_custom_call.1
= control target key start
LH: loop header
LB: loop body
LE: loop exit
PB: predicated region body
PF: predicated region fallthrough
CT: control target
= control target key end

     0   :  { %vm614_vm0 = vcmask 130048   ;;  %vm1317_vm1 = vcmask 261120   ;;  %s4276_s0 = inlined_call_operand.vmem [shape: bf16[1024,32], index: 0, kind: input, shape index: {}]   ;;  %s4277_s1 = inlined_call_operand.vmem [shape: bf16[1024,16], index: 1, kind: input, shape index: {}]   ;;  %s4278_s2 = inlined_call_operand.vmem [shape: bf16[48,32], index: 2, kind: input, shape index: {}]   ;;  %s4279_s3 = inlined_call_operand.vmem [shape: f32[72,8], index: 3, kind: input, shape index: {}]   ;;  %s4280_s4 = inlined_call_operand.hbm [shape: f32[1,1024], index: 4, kind: output, shape index: {}]  }
   0x1   :  { %v3060_v0 = vld [vmem:[%s4277_s1 + $0x40] sm:$0xff]   ;;  %v3064_v5 = vld [vmem:[%s4277_s1 + $0x48] sm:$0xff]   ;;  %v3068_v11 = vld [vmem:[%s4277_s1 + $0x50] sm:$0xff]  }
   0x2   :  { %v3061_v1 = vld [vmem:[%s4277_s1 + $0xc0] sm:$0xff]   ;;  %2970 = vmatprep.subr.msk.bf16.mxu0 %vm614_vm0, %v3060_v0  ;;  %v3065_v7 = vld [vmem:[%s4277_s1 + $0xc8] sm:$0xff]   ;;  %v3069_v13 = vld [vmem:[%s4277_s1 + $0xd0] sm:$0xff]  }
   0x3   :  { %v3062_v2 = vld [vmem:[%s4277_s1] sm:$0xff]   ;;  %2978 = vmatprep.subr.msk.bf16.mxu1 %vm614_vm0, %v3061_v1  ;;  %v3066_v8 = vld [vmem:[%s4277_s1 + $0x8] sm:$0xff]   ;;  %v3070_v14 = vld [vmem:[%s4277_s1 + $0x10] sm:$0xff]  }
   0x4   :  { %v3063_v3 = vld [vmem:[%s4277_s1 + $0x80] sm:$0xff]   ;;  %v619_v4 = vsel %vm614_vm0, %v3062_v2, 0  ;;  %v3067_v9 = vld [vmem:[%s4277_s1 + $0x88] sm:$0xff]   ;;  %v622_v10 = vsel %vm614_vm0, %v3066_v8, 0  ;;  %v3071_v15 = vld [vmem:[%s4277_s1 + $0x90] sm:$0xff]   ;;  %v625_v16 = vsel %vm614_vm0, %v3070_v14, 0 }
   0x5   :  { %2827 = vmatpush3.bf16.xpose.msra.mxu0 %v619_v4  ;;  %v667_v6 = vsel %vm614_vm0, %v3063_v3, 0  ;;  %v670_v12 = vsel %vm614_vm0, %v3067_v9, 0  ;;  %v3072_v17 = vld [vmem:[%s4277_s1 + $0x58] sm:$0xff]   ;;  %v673_v18 = vsel %vm614_vm0, %v3071_v15, 0  ;;  %v3076_v23 = vld [vmem:[%s4277_s1 + $0x60] sm:$0xff]   ;;  %v3330_v28 = vld [vmem:[%s4278_s2 + $0x10] sm:$0xff]  }
   0x6   :  { %2845 = vmatpush3.bf16.xpose.msra.mxu1 %v667_v6  ;;  %2971 = vmatprep.subr.msk.bf16.mxu0 %vm614_vm0, %v3064_v5  ;;  %v3073_v19 = vld [vmem:[%s4277_s1 + $0xd8] sm:$0xff]   ;;  %v3077_v25 = vld [vmem:[%s4277_s1 + $0xe0] sm:$0xff]   ;;  %v3080_v30 = vld [vmem:[%s4277_s1 + $0x68] sm:$0xff]  }
   0x7   :  { %2979 = vmatprep.subr.msk.bf16.mxu1 %vm614_vm0, %v3065_v7  ;;  %v3074_v20 = vld [vmem:[%s4277_s1 + $0x18] sm:$0xff]   ;;  %v3078_v26 = vld [vmem:[%s4277_s1 + $0x20] sm:$0xff]   ;;  %2842 = vmatprep.mubr.msk.bf16.mxu0 %vm614_vm0, %v3330_v28  ;;  %v3081_v32 = vld [vmem:[%s4277_s1 + $0xe8] sm:$0xff]  }
   0x8   :  { %v3075_v21 = vld [vmem:[%s4277_s1 + $0x98] sm:$0xff]   ;;  %v628_v22 = vsel %vm614_vm0, %v3074_v20, 0  ;;  %v3079_v27 = vld [vmem:[%s4277_s1 + $0xa0] sm:$0xff]   ;;  %v631_v29 = vsel %vm614_vm0, %v3078_v26, 0  ;;  %2860 = vmatprep.mubr.msk.bf16.mxu1 %vm614_vm0, %v3330_v28  ;;  %v3082_v33 = vld [vmem:[%s4277_s1 + $0x28] sm:$0xff]  }
   0x9   :  { %v676_v24 = vsel %vm614_vm0, %v3075_v21, 0  ;;  %v679_v31 = vsel %vm614_vm0, %v3079_v27, 0  ;;  %v3083_v34 = vld [vmem:[%s4277_s1 + $0xa8] sm:$0xff]   ;;  %v634_v35 = vsel %vm614_vm0, %v3082_v33, 0  ;;  %v3084_v36 = vld [vmem:[%s4277_s1 + $0x70] sm:$0xff]   ;;  %v3088_v42 = vld [vmem:[%s4277_s1 + $0x78] sm:$0xff]  }
   0xa   :  { %v682_v37 = vsel %vm614_vm0, %v3083_v34, 0  ;;  %v3085_v38 = vld [vmem:[%s4277_s1 + $0xf0] sm:$0xff]   ;;  %v3089_v44 = vld [vmem:[%s4277_s1 + $0xf8] sm:$0xff]   ;;  %v3093_v48 = vld [vmem:[%s4277_s1 + $0x140] sm:$0xff]  }
   0xb   :  { %v3086_v39 = vld [vmem:[%s4277_s1 + $0x30] sm:$0xff]   ;;  %v3090_v45 = vld [vmem:[%s4277_s1 + $0x38] sm:$0xff]   ;;  %v3094_v50 = vld [vmem:[%s4277_s1 + $0x1c0] sm:$0xff]  }
   0xc   :  { %v3087_v40 = vld [vmem:[%s4277_s1 + $0xb0] sm:$0xff]   ;;  %v637_v41 = vsel %vm614_vm0, %v3086_v39, 0  ;;  %v3091_v46 = vld [vmem:[%s4277_s1 + $0xb8] sm:$0xff]   ;;  %v640_v47 = vsel %vm614_vm0, %v3090_v45, 0  ;;  %v3095_v51 = vld [vmem:[%s4277_s1 + $0x100] sm:$0xff]  }
   0xd   :  { %2829 = vmatpush3.bf16.xpose.msra.mxu0 %v622_v10  ;;  %v685_v43 = vsel %vm614_vm0, %v3087_v40, 0  ;;  %v688_v49 = vsel %vm614_vm0, %v3091_v46, 0  ;;  %v3096_v52 = vld [vmem:[%s4277_s1 + $0x180] sm:$0xff]   ;;  %v715_v53 = vsel %vm614_vm0, %v3095_v51, 0  ;;  %v3097_v54 = vld [vmem:[%s4277_s1 + $0x148] sm:$0xff]   ;;  %v3101_v60 = vld [vmem:[%s4277_s1 + $0x150] sm:$0xff]  }
   0xe   :  { %2847 = vmatpush3.bf16.xpose.msra.mxu1 %v670_v12  ;;  %2972 = vmatprep.subr.msk.bf16.mxu0 %vm614_vm0, %v3068_v11  ;;  %v763_v55 = vsel %vm614_vm0, %v3096_v52, 0  ;;  %v3098_v56 = vld [vmem:[%s4277_s1 + $0x1c8] sm:$0xff]   ;;  %v3102_v62 = vld [vmem:[%s4277_s1 + $0x1d0] sm:$0xff]   ;;  %v3105_v2 = vld [vmem:[%s4277_s1 + $0x158] sm:$0xff]  }
   0xf   :  { %2980 = vmatprep.subr.msk.bf16.mxu1 %vm614_vm0, %v3069_v13  ;;  %v3099_v57 = vld [vmem:[%s4277_s1 + $0x108] sm:$0xff]   ;;  %v3103_v63 = vld [vmem:[%s4277_s1 + $0x110] sm:$0xff]   ;;  %v3106_v4 = vld [vmem:[%s4277_s1 + $0x1d8] sm:$0xff]  }
  0x10   :  { %v3100_v58 = vld [vmem:[%s4277_s1 + $0x188] sm:$0xff]   ;;  %v718_v59 = vsel %vm614_vm0, %v3099_v57, 0  ;;  %v3104_v0 = vld [vmem:[%s4277_s1 + $0x190] sm:$0xff]   ;;  %v721_v1 = vsel %vm614_vm0, %v3103_v63, 0  ;;  %v3107_v5 = vld [vmem:[%s4277_s1 + $0x118] sm:$0xff]  }
  0x11   :  { %v766_v61 = vsel %vm614_vm0, %v3100_v58, 0  ;;  %v769_v3 = vsel %vm614_vm0, %v3104_v0, 0  ;;  %v3108_v6 = vld [vmem:[%s4277_s1 + $0x198] sm:$0xff]   ;;  %v724_v7 = vsel %vm614_vm0, %v3107_v5, 0  ;;  %v3109_v8 = vld [vmem:[%s4277_s1 + $0x160] sm:$0xff]   ;;  %v3113_v14 = vld [vmem:[%s4277_s1 + $0x168] sm:$0xff]  }
  0x12   :  { %v772_v9 = vsel %vm614_vm0, %v3108_v6, 0  ;;  %v3110_v10 = vld [vmem:[%s4277_s1 + $0x1e0] sm:$0xff]   ;;  %v3117_v20 = vld [vmem:[%s4277_s1 + $0x170] sm:$0xff]   ;;  %v3121_v26 = vld [vmem:[%s4277_s1 + $0x178] sm:$0xff]  }
  0x13   :  { %v3111_v11 = vld [vmem:[%s4277_s1 + $0x120] sm:$0xff]   ;;  %v3129_v39 = vld [vmem:[%s4276_s0 + $0x48] sm:$0xff]  }
  0x14   :  { %v3112_v12 = vld [vmem:[%s4277_s1 + $0x1a0] sm:$0xff]   ;;  %v727_v13 = vsel %vm614_vm0, %v3111_v11, 0 }
  0x15   :  { %2831 = vmatpush3.bf16.xpose.msra.mxu0 %v625_v16  ;;  %v775_v15 = vsel %vm614_vm0, %v3112_v12, 0  ;;  %v3114_v16 = vld [vmem:[%s4277_s1 + $0x1e8] sm:$0xff]   ;;  %v3125_v33 = vld [vmem:[%s4276_s0 + $0x40] sm:$0xff]  }
  0x16   :  { %2849 = vmatpush3.bf16.xpose.msra.mxu1 %v673_v18  ;;  %2973 = vmatprep.subr.msk.bf16.mxu0 %vm614_vm0, %v3072_v17  ;;  %v3115_v17 = vld [vmem:[%s4277_s1 + $0x128] sm:$0xff]  }
  0x17   :  { %2981 = vmatprep.subr.msk.bf16.mxu1 %vm614_vm0, %v3073_v19  ;;  %v3116_v18 = vld [vmem:[%s4277_s1 + $0x1a8] sm:$0xff]   ;;  %v730_v19 = vsel %vm614_vm0, %v3115_v17, 0 }
  0x18   :  { %v778_v21 = vsel %vm614_vm0, %v3116_v18, 0 }
  0x1d   :  { %2833 = vmatpush3.bf16.xpose.msra.mxu0 %v628_v22  ;;  %v3118_v22 = vld [vmem:[%s4277_s1 + $0x1f0] sm:$0xff]  }
  0x1e   :  { %2851 = vmatpush3.bf16.xpose.msra.mxu1 %v676_v24  ;;  %2974 = vmatprep.subr.msk.bf16.mxu0 %vm614_vm0, %v3076_v23  ;;  %v3119_v23 = vld [vmem:[%s4277_s1 + $0x130] sm:$0xff]  }
  0x1f   :  { %2982 = vmatprep.subr.msk.bf16.mxu1 %vm614_vm0, %v3077_v25  ;;  %v3120_v24 = vld [vmem:[%s4277_s1 + $0x1b0] sm:$0xff]   ;;  %v733_v25 = vsel %vm614_vm0, %v3119_v23, 0 }
  0x20   :  { %v781_v27 = vsel %vm614_vm0, %v3120_v24, 0 }
  0x25   :  { %2835 = vmatpush3.bf16.xpose.msra.mxu0 %v631_v29  ;;  %v3122_v29 = vld [vmem:[%s4277_s1 + $0x1f8] sm:$0xff]  }
  0x26   :  { %2853 = vmatpush3.bf16.xpose.msra.mxu1 %v679_v31  ;;  %2975 = vmatprep.subr.msk.bf16.mxu0 %vm614_vm0, %v3080_v30  ;;  %v3123_v30 = vld [vmem:[%s4277_s1 + $0x138] sm:$0xff]  }
  0x27   :  { %2983 = vmatprep.subr.msk.bf16.mxu1 %vm614_vm0, %v3081_v32  ;;  %v3124_v31 = vld [vmem:[%s4277_s1 + $0x1b8] sm:$0xff]   ;;  %v736_v32 = vsel %vm614_vm0, %v3123_v30, 0 }
  0x28   :  { %v784_v34 = vsel %vm614_vm0, %v3124_v31, 0 }
  0x2d   :  { %2837 = vmatpush3.bf16.xpose.msra.mxu0 %v634_v35  ;;  %v3126_v35 = vld [vmem:[%s4276_s0 + $0xc0] sm:$0xff]  }
  0x2e   :  { %2855 = vmatpush3.bf16.xpose.msra.mxu1 %v682_v37  ;;  %2976 = vmatprep.subr.msk.bf16.mxu0 %vm614_vm0, %v3084_v36  ;;  %v3127_v36 = vld [vmem:[%s4276_s0] sm:$0xff]  }
  0x2f   :  { %2984 = vmatprep.subr.msk.bf16.mxu1 %vm614_vm0, %v3085_v38  ;;  %v3128_v37 = vld [vmem:[%s4276_s0 + $0x80] sm:$0xff]   ;;  %v1322_v38 = vsel %vm1317_vm1, %v3127_v36, 0 }
  0x35   :  { %2839 = vmatpush3.bf16.xpose.msra.mxu0 %v637_v41 }
  0x36   :  { %2857 = vmatpush3.bf16.xpose.msra.mxu1 %v685_v43  ;;  %2977 = vmatprep.subr.msk.bf16.mxu0 %vm614_vm0, %v3088_v42 }
  0x37   :  { %2985 = vmatprep.subr.msk.bf16.mxu1 %vm614_vm0, %v3089_v44 }
  0x3d   :  { %2841 = vmatpush3.bf16.xpose.msra.mxu0 %v640_v47 }
  0x3e   :  { %2859 = vmatpush3.bf16.xpose.msra.mxu1 %v688_v49  ;;  %2986 = vmatprep.subr.msk.bf16.mxu0 %vm614_vm0, %v3093_v48 }
  0x3f   :  { %2994 = vmatprep.subr.msk.bf16.mxu1 %vm614_vm0, %v3094_v50 }
  0x44   :  { %2843 = vmatmul.mubr.msk.bf16.vlgmr.msra.gmra.mrb[0].mxu0 %vm614_vm0, %v3330_v28 }
  0x45   :  { %2861 = vmatmul.mubr.msk.bf16.vlgmr.msra.gmra.mrb[0].mxu1 %vm614_vm0, %v3330_v28  ;;  %2863 = vmatpush3.bf16.xpose.msra.mxu0 %v715_v53 }
  0x46   :  { %2881 = vmatpush3.bf16.xpose.msra.mxu1 %v763_v55  ;;  %2987 = vmatprep.subr.msk.bf16.mxu0 %vm614_vm0, %v3097_v54 }
  0x47   :  { %2995 = vmatprep.subr.msk.bf16.mxu1 %vm614_vm0, %v3098_v56  ;;  %2878 = vmatprep.mubr.msk.bf16.mxu0 %vm614_vm0, %v3330_v28 }
  0x48   :  { %2896 = vmatprep.mubr.msk.bf16.mxu1 %vm614_vm0, %v3330_v28 }
  0x4d   :  { %2865 = vmatpush3.bf16.xpose.msra.mxu0 %v718_v59 }
  0x4e   :  { %2883 = vmatpush3.bf16.xpose.msra.mxu1 %v766_v61  ;;  %2988 = vmatprep.subr.msk.bf16.mxu0 %vm614_vm0, %v3101_v60 }
  0x4f   :  { %2996 = vmatprep.subr.msk.bf16.mxu1 %vm614_vm0, %v3102_v62 }
  0x55   :  { %2867 = vmatpush3.bf16.xpose.msra.mxu0 %v721_v1 }
  0x56   :  { %2885 = vmatpush3.bf16.xpose.msra.mxu1 %v769_v3  ;;  %2989 = vmatprep.subr.msk.bf16.mxu0 %vm614_vm0, %v3105_v2 }
  0x57   :  { %2997 = vmatprep.subr.msk.bf16.mxu1 %vm614_vm0, %v3106_v4 }
  0x5d   :  { %2869 = vmatpush3.bf16.xpose.msra.mxu0 %v724_v7 }
  0x5e   :  { %2887 = vmatpush3.bf16.xpose.msra.mxu1 %v772_v9  ;;  %2990 = vmatprep.subr.msk.bf16.mxu0 %vm614_vm0, %v3109_v8 }
  0x5f   :  { %2998 = vmatprep.subr.msk.bf16.mxu1 %vm614_vm0, %v3110_v10 }
  0x65   :  { %2871 = vmatpush3.bf16.xpose.msra.mxu0 %v727_v13 }
  0x66   :  { %2889 = vmatpush3.bf16.xpose.msra.mxu1 %v775_v15  ;;  %2991 = vmatprep.subr.msk.bf16.mxu0 %vm614_vm0, %v3113_v14 }
  0x67   :  { %2999 = vmatprep.subr.msk.bf16.mxu1 %vm614_vm0, %v3114_v16 }
  0x6d   :  { %2873 = vmatpush3.bf16.xpose.msra.mxu0 %v730_v19 }
  0x6e   :  { %2891 = vmatpush3.bf16.xpose.msra.mxu1 %v778_v21  ;;  %2992 = vmatprep.subr.msk.bf16.mxu0 %vm614_vm0, %v3117_v20 }
  0x6f   :  { %3000 = vmatprep.subr.msk.bf16.mxu1 %vm614_vm0, %v3118_v22 }
  0x75   :  { %2875 = vmatpush3.bf16.xpose.msra.mxu0 %v733_v25 }
  0x76   :  { %2893 = vmatpush3.bf16.xpose.msra.mxu1 %v781_v27  ;;  %2993 = vmatprep.subr.msk.bf16.mxu0 %vm614_vm0, %v3121_v26 }
  0x77   :  { %3001 = vmatprep.subr.msk.bf16.mxu1 %vm614_vm0, %v3122_v29 }
  0x7d   :  { %2877 = vmatpush3.bf16.xpose.msra.mxu0 %v736_v32 }
  0x7e   :  { %2895 = vmatpush3.bf16.xpose.msra.mxu1 %v784_v34  ;;  %3002 = vmatprep.subr.msk.bf16.mxu0 %vm1317_vm1, %v3125_v33 }
  0x7f   :  { %3010 = vmatprep.subr.msk.bf16.mxu1 %vm1317_vm1, %v3126_v35 }
  0x80   :  { %9 = vsyncpa [#allocation3], 0  ;;  %v1370_v40 = vsel %vm1317_vm1, %v3128_v37, 0  ;;  %v3130_v41 = vld [vmem:[%s4276_s0 + $0xc8] sm:$0xff]   ;;  %v3547_v42 = vld [vmem:[%s4278_s2] sm:$0xff]  }
  0x81   :  { %v3131_v43 = vld [vmem:[%s4276_s0 + $0x8] sm:$0xff]   ;;  %v24_v44 = vld [vmem:[%s4279_s3] sm:$0xff]  ;;  %v3133_v47 = vld [vmem:[%s4276_s0 + $0x50] sm:$0xff]  }
  0x82   :  { %v3132_v45 = vld [vmem:[%s4276_s0 + $0x88] sm:$0xff]   ;;  %v1325_v46 = vsel %vm1317_vm1, %v3131_v43, 0  ;;  %v3134_v49 = vld [vmem:[%s4276_s0 + $0xd0] sm:$0xff]   ;;  %v3137_v53 = vld [vmem:[%s4276_s0 + $0x58] sm:$0xff]  }
  0x83   :  { %v1373_v48 = vsel %vm1317_vm1, %v3132_v45, 0  ;;  %v3135_v50 = vld [vmem:[%s4276_s0 + $0x10] sm:$0xff]   ;;  %v3138_v55 = vld [vmem:[%s4276_s0 + $0xd8] sm:$0xff]   ;;  %v3141_v59 = vld [vmem:[%s4276_s0 + $0x60] sm:$0xff]  }
  0x84   :  { %2879 = vmatmul.mubr.msk.bf16.vlgmr.msra.gmra.mrb[4].mxu0 %vm614_vm0, %v3330_v28  ;;  %v3136_v51 = vld [vmem:[%s4276_s0 + $0x90] sm:$0xff]   ;;  %v1328_v52 = vsel %vm1317_vm1, %v3135_v50, 0  ;;  %v3139_v56 = vld [vmem:[%s4276_s0 + $0x18] sm:$0xff]   ;;  %v25_v60 = vld [vmem:[%s4279_s3 + $0x8] sm:$0xff] }
  0x85   :  { %2897 = vmatmul.mubr.msk.bf16.vlgmr.msra.gmra.mrb[4].mxu1 %vm614_vm0, %v3330_v28  ;;  %2899 = vmatpush3.bf16.xpose.msra.mxu0 %v1322_v38  ;;  %v3214_v28 = vmov 0   ;;  %v1376_v54 = vsel %vm1317_vm1, %v3136_v51, 0  ;;  %v3140_v57 = vld [vmem:[%s4276_s0 + $0x98] sm:$0xff]   ;;  %v1331_v58 = vsel %vm1317_vm1, %v3139_v56, 0  ;;  %v3142_v62 = vld [vmem:[%s4276_s0 + $0xe0] sm:$0xff]   ;;  %v3145_v2 = vld [vmem:[%s4276_s0 + $0x68] sm:$0xff]  }
  0x86   :  { %2917 = vmatpush3.bf16.xpose.msra.mxu1 %v1370_v40  ;;  %3003 = vmatprep.subr.msk.bf16.mxu0 %vm1317_vm1, %v3129_v39  ;;  %v1379_v61 = vsel %vm1317_vm1, %v3140_v57, 0  ;;  %v3143_v63 = vld [vmem:[%s4276_s0 + $0x20] sm:$0xff]   ;;  %v3146_v4 = vld [vmem:[%s4276_s0 + $0xe8] sm:$0xff]   ;;  %v3149_v8 = vld [vmem:[%s4276_s0 + $0x70] sm:$0xff]  }
  0x87   :  { %3011 = vmatprep.subr.msk.bf16.mxu1 %vm1317_vm1, %v3130_v41  ;;  %2914 = vmatprep.mubr.msk.bf16.mxu0 %vm1317_vm1, %v3547_v42  ;;  %v3144_v0 = vld [vmem:[%s4276_s0 + $0xa0] sm:$0xff]   ;;  %v1334_v1 = vsel %vm1317_vm1, %v3143_v63, 0  ;;  %v3147_v5 = vld [vmem:[%s4276_s0 + $0x28] sm:$0xff]   ;;  %v3150_v10 = vld [vmem:[%s4276_s0 + $0xf0] sm:$0xff]  }
  0x88   :  { %2932 = vmatprep.mubr.msk.bf16.mxu1 %vm1317_vm1, %v3547_v42  ;;  %3044 = vset.pattern.permute.xlu0 %v3214_v28  ;;  %v1382_v3 = vsel %vm1317_vm1, %v3144_v0, 0  ;;  %v3148_v6 = vld [vmem:[%s4276_s0 + $0xa8] sm:$0xff]   ;;  %v1337_v7 = vsel %vm1317_vm1, %v3147_v5, 0  ;;  %v3151_v11 = vld [vmem:[%s4276_s0 + $0x30] sm:$0xff]   ;;  %v3153_v14 = vld [vmem:[%s4276_s0 + $0x78] sm:$0xff]  }
  0x89   :  { %984 = vperm.xlu0 %3044, %v24_v44   ;;  %3045 = vset.pattern.permute.xlu1 %v3214_v28  ;;  %v1385_v9 = vsel %vm1317_vm1, %v3148_v6, 0  ;;  %v3152_v12 = vld [vmem:[%s4276_s0 + $0xb0] sm:$0xff]   ;;  %v1340_v13 = vsel %vm1317_vm1, %v3151_v11, 0  ;;  %v3154_v16 = vld [vmem:[%s4276_s0 + $0xf8] sm:$0xff]   ;;  %v3158_v20 = vld [vmem:[%s4276_s0 + $0x140] sm:$0xff]  }
  0x8a   :  { %v1388_v15 = vsel %vm1317_vm1, %v3152_v12, 0  ;;  %v3155_v17 = vld [vmem:[%s4276_s0 + $0x38] sm:$0xff]   ;;  %v3159_v22 = vld [vmem:[%s4276_s0 + $0x1c0] sm:$0xff]   ;;  %v3162_v26 = vld [vmem:[%s4276_s0 + $0x148] sm:$0xff]  }
  0x8b   :  { %v3156_v18 = vld [vmem:[%s4276_s0 + $0xb8] sm:$0xff]   ;;  %v1343_v19 = vsel %vm1317_vm1, %v3155_v17, 0  ;;  %v3160_v23 = vld [vmem:[%s4276_s0 + $0x100] sm:$0xff]   ;;  %v3163_v29 = vld [vmem:[%s4276_s0 + $0x1c8] sm:$0xff]  }
  0x8c   :  { %v1391_v21 = vsel %vm1317_vm1, %v3156_v18, 0  ;;  %v3161_v24 = vld [vmem:[%s4276_s0 + $0x180] sm:$0xff]   ;;  %v1418_v25 = vsel %vm1317_vm1, %v3160_v23, 0  ;;  %v3164_v30 = vld [vmem:[%s4276_s0 + $0x108] sm:$0xff]   ;;  %v3166_v33 = vld [vmem:[%s4276_s0 + $0x150] sm:$0xff]  }
  0x8d   :  { %2901 = vmatpush3.bf16.xpose.msra.mxu0 %v1325_v46  ;;  %989 = vperm.xlu0 %3044, %v25_v60   ;;  %v1466_v27 = vsel %vm1317_vm1, %v3161_v24, 0  ;;  %v3165_v31 = vld [vmem:[%s4276_s0 + $0x188] sm:$0xff]   ;;  %v1421_v32 = vsel %vm1317_vm1, %v3164_v30, 0  ;;  %v3167_v35 = vld [vmem:[%s4276_s0 + $0x1d0] sm:$0xff]   ;;  %v3170_v39 = vld [vmem:[%s4276_s0 + $0x158] sm:$0xff]   ;;  %v3215_v24 = vmov 1  }
  0x8e   :  { %2919 = vmatpush3.bf16.xpose.msra.mxu1 %v1373_v48  ;;  %3004 = vmatprep.subr.msk.bf16.mxu0 %vm1317_vm1, %v3133_v47  ;;  %v1469_v34 = vsel %vm1317_vm1, %v3165_v31, 0  ;;  %v3168_v36 = vld [vmem:[%s4276_s0 + $0x110] sm:$0xff]   ;;  %v3171_v41 = vld [vmem:[%s4276_s0 + $0x1d8] sm:$0xff]   ;;  %v3174_v46 = vld [vmem:[%s4276_s0 + $0x160] sm:$0xff]   ;;  %v3220_v31 = vmov 5  }
  0x8f   :  { %3012 = vmatprep.subr.msk.bf16.mxu1 %vm1317_vm1, %v3134_v49  ;;  %v3169_v37 = vld [vmem:[%s4276_s0 + $0x190] sm:$0xff]   ;;  %v1424_v38 = vsel %vm1317_vm1, %v3168_v36, 0  ;;  %v3172_v43 = vld [vmem:[%s4276_s0 + $0x118] sm:$0xff]   ;;  %v3175_v48 = vld [vmem:[%s4276_s0 + $0x1e0] sm:$0xff]  }
  0x90   :  { %v1472_v40 = vsel %vm1317_vm1, %v3169_v37, 0  ;;  %v3173_v44 = vld [vmem:[%s4276_s0 + $0x198] sm:$0xff]   ;;  %v1427_v45 = vsel %vm1317_vm1, %v3172_v43, 0  ;;  %v3176_v49 = vld [vmem:[%s4276_s0 + $0x120] sm:$0xff]   ;;  %v3181_v56 = vld [vmem:[%s4276_s0 + $0x1a8] sm:$0xff]  }
  0x91   :  { %v1475_v47 = vsel %vm1317_vm1, %v3173_v44, 0  ;;  %v3177_v50 = vld [vmem:[%s4276_s0 + $0x1a0] sm:$0xff]   ;;  %v1430_v51 = vsel %vm1317_vm1, %v3176_v49, 0  ;;  %v3183_v60 = vld [vmem:[%s4276_s0 + $0x1f0] sm:$0xff]   ;;  %v3186_v0 = vld [vmem:[%s4276_s0 + $0x178] sm:$0xff]   ;;  %3046 = vset.pattern.permute.xlu0 %v3215_v24 }
  0x92   :  { %v27_v23 = vld [vmem:[%s4279_s3 + $0x18] sm:$0xff]  ;;  %v29_v30 = vld [vmem:[%s4279_s3 + $0x28] sm:$0xff] }
  0x93   :  { %1935 = vperm.xlu0 %3046, %v27_v23   ;;  %v31_v37 = vld [vmem:[%s4279_s3 + $0x38] sm:$0xff] }
  0x95   :  { %2903 = vmatpush3.bf16.xpose.msra.mxu0 %v1328_v52  ;;  %v3178_v52 = vld [vmem:[%s4276_s0 + $0x168] sm:$0xff]  }
  0x96   :  { %2921 = vmatpush3.bf16.xpose.msra.mxu1 %v1376_v54  ;;  %3005 = vmatprep.subr.msk.bf16.mxu0 %vm1317_vm1, %v3137_v53  ;;  %v1478_v53 = vsel %vm1317_vm1, %v3177_v50, 0  ;;  %v3179_v54 = vld [vmem:[%s4276_s0 + $0x1e8] sm:$0xff]  }
  0x97   :  { %3013 = vmatprep.subr.msk.bf16.mxu1 %vm1317_vm1, %v3138_v55  ;;  %v3180_v55 = vld [vmem:[%s4276_s0 + $0x128] sm:$0xff]  }
  0x98   :  { %v1433_v57 = vsel %vm1317_vm1, %v3180_v55, 0 }
  0x9d   :  { %2905 = vmatpush3.bf16.xpose.msra.mxu0 %v1331_v58  ;;  %v3182_v58 = vld [vmem:[%s4276_s0 + $0x170] sm:$0xff]  }
  0x9e   :  { %2923 = vmatpush3.bf16.xpose.msra.mxu1 %v1379_v61  ;;  %3006 = vmatprep.subr.msk.bf16.mxu0 %vm1317_vm1, %v3141_v59  ;;  %v1481_v59 = vsel %vm1317_vm1, %v3181_v56, 0  ;;  %v3184_v61 = vld [vmem:[%s4276_s0 + $0x130] sm:$0xff]  }
  0x9f   :  { %3014 = vmatprep.subr.msk.bf16.mxu1 %vm1317_vm1, %v3142_v62  ;;  %v3185_v62 = vld [vmem:[%s4276_s0 + $0x1b0] sm:$0xff]   ;;  %v1436_v63 = vsel %vm1317_vm1, %v3184_v61, 0 }
  0xa5   :  { %2907 = vmatpush3.bf16.xpose.msra.mxu0 %v1334_v1  ;;  %v1484_v1 = vsel %vm1317_vm1, %v3185_v62, 0 }
  0xa6   :  { %2925 = vmatpush3.bf16.xpose.msra.mxu1 %v1382_v3  ;;  %3007 = vmatprep.subr.msk.bf16.mxu0 %vm1317_vm1, %v3145_v2  ;;  %v3187_v2 = vld [vmem:[%s4276_s0 + $0x1f8] sm:$0xff]  }
  0xa7   :  { %3015 = vmatprep.subr.msk.bf16.mxu1 %vm1317_vm1, %v3146_v4  ;;  %v3188_v3 = vld [vmem:[%s4276_s0 + $0x138] sm:$0xff]  }
  0xa8   :  { %v3189_v4 = vld [vmem:[%s4276_s0 + $0x1b8] sm:$0xff]   ;;  %v1439_v5 = vsel %vm1317_vm1, %v3188_v3, 0 }
  0xa9   :  { %v1487_v6 = vsel %vm1317_vm1, %v3189_v4, 0  ;;  %v21_v4 = vld [vmem:[%s4278_s2 + $0x8] sm:$0xf]  ;;  %s3223_s2 = smov [#allocation2]  }
  0xaa   :  { %s2676_s27 = sshll.u32 %s3223_s2, 4  ;;  %s2677_s27 = int_to_ptr.vmem [resolvable:$true] %s2676_s27 }
  0xab   :  { %s3190_s28 = scalar_lea.vmem %s2677_s27, 128  ;;  %p3195_p1 = scmp.lt.s32.totalorder %s2677_s27, %s2677_s27 }
  0xac   :  { %p3191_p0 = scmp.ne.s32.totalorder %s2677_s27, %s3190_s28  ;;  %p3196_p2 = scmp.lt.s32.totalorder %s3190_s28, %s3190_s28 }
  0xad   :  { %2909 = vmatpush3.bf16.xpose.msra.mxu0 %v1337_v7 }
  0xae   :  { %2927 = vmatpush3.bf16.xpose.msra.mxu1 %v1385_v9  ;;  %3008 = vmatprep.subr.msk.bf16.mxu0 %vm1317_vm1, %v3149_v8  ;;  %p3197_p3 = por %p3196_p2, %p3195_p1 }
  0xaf   :  { %3016 = vmatprep.subr.msk.bf16.mxu1 %vm1317_vm1, %v3150_v10 }
  0xb0   :  { %p3198_p4 = pnand %p3197_p3, %p3191_p0 }
  0xb5   :  { %2911 = vmatpush3.bf16.xpose.msra.mxu0 %v1340_v13 }
  0xb6   :  { %2929 = vmatpush3.bf16.xpose.msra.mxu1 %v1388_v15  ;;  %3009 = vmatprep.subr.msk.bf16.mxu0 %vm1317_vm1, %v3153_v14 }
  0xb7   :  { %3017 = vmatprep.subr.msk.bf16.mxu1 %vm1317_vm1, %v3154_v16 }
  0xbd   :  { %2913 = vmatpush3.bf16.xpose.msra.mxu0 %v1343_v19 }
  0xbe   :  { %2931 = vmatpush3.bf16.xpose.msra.mxu1 %v1391_v21  ;;  %3018 = vmatprep.subr.msk.bf16.mxu0 %vm1317_vm1, %v3158_v20 }
  0xbf   :  { %3026 = vmatprep.subr.msk.bf16.mxu1 %vm1317_vm1, %v3159_v22  ;;  %v26_v22 = vld [vmem:[%s4279_s3 + $0x10] sm:$0xff] }
  0xc0   :  { %1711 = vperm.xlu1 %3045, %v26_v22  }
  0xc4   :  { %2915 = vmatmul.mubr.msk.bf16.vlgmr.msra.gmra.mrb[8].mxu0 %vm1317_vm1, %v3547_v42  ;;  %1891 = vperm.xlu1 %3045, %v27_v23  }
  0xc5   :  { %2933 = vmatmul.mubr.msk.bf16.vlgmr.msra.gmra.mrb[8].mxu1 %vm1317_vm1, %v3547_v42  ;;  %2935 = vmatpush3.bf16.xpose.msra.mxu0 %v1418_v25  ;;  %v3216_v25 = vmov 4  }
  0xc6   :  { %2953 = vmatpush3.bf16.xpose.msra.mxu1 %v1466_v27  ;;  %3019 = vmatprep.subr.msk.bf16.mxu0 %vm1317_vm1, %v3162_v26  ;;  %v3217_v26 = vmov 2   ;;  %v3218_v27 = vmov 7  }
  0xc7   :  { %3027 = vmatprep.subr.msk.bf16.mxu1 %vm1317_vm1, %v3163_v29  ;;  %2950 = vmatprep.mubr.msk.bf16.mxu0 %vm1317_vm1, %v3547_v42  ;;  %v3219_v29 = vmov 3  }
  0xc8   :  { %2968 = vmatprep.mubr.msk.bf16.mxu1 %vm1317_vm1, %v3547_v42  ;;  %3049 = vset.pattern.permute.xlu0 %v3216_v25 }
  0xc9   :  { %2091 = vperm.xlu0 %3049, %v27_v23   ;;  %3047 = vset.pattern.permute.xlu1 %v3217_v26 }
  0xca   :  { %1987 = vperm.xlu1 %3047, %v27_v23  }
  0xcd   :  { %2937 = vmatpush3.bf16.xpose.msra.mxu0 %v1421_v32  ;;  %3052 = vset.pattern.permute.xlu0 %v3218_v27  ;;  %v30_v32 = vld [vmem:[%s4279_s3 + $0x30] sm:$0xff] }
  0xce   :  { %2955 = vmatpush3.bf16.xpose.msra.mxu1 %v1469_v34  ;;  %3020 = vmatprep.subr.msk.bf16.mxu0 %vm1317_vm1, %v3166_v33  ;;  %v32_v33 = vld [vmem:[%s4279_s3 + $0x40] sm:$0xff]  ;;  %v3221_v34 = vmov 6  }
  0xcf   :  { %3028 = vmatprep.subr.msk.bf16.mxu1 %vm1317_vm1, %v3167_v35  ;;  %2247 = vperm.xlu0 %3052, %v27_v23   ;;  %v28_v35 = vld [vmem:[%s4279_s3 + $0x20] sm:$0xff] }
  0xd0   :  { %3048 = vset.pattern.permute.xlu1 %v3219_v29 }
  0xd1   :  { %2039 = vperm.xlu1 %3048, %v27_v23  }
  0xd3   :  { %3054 = vset.pattern.permute.xlu0 %v3215_v24 }
  0xd4   :  { %2365 = vperm.xlu0 %3054, %v29_v30  }
  0xd5   :  { %2939 = vmatpush3.bf16.xpose.msra.mxu0 %v1424_v38  ;;  %3050 = vset.pattern.permute.xlu1 %v3220_v31 }
  0xd6   :  { %2957 = vmatpush3.bf16.xpose.msra.mxu1 %v1472_v40  ;;  %3021 = vmatprep.subr.msk.bf16.mxu0 %vm1317_vm1, %v3170_v39 }
  0xd7   :  { %3029 = vmatprep.subr.msk.bf16.mxu1 %vm1317_vm1, %v3171_v41  ;;  %2143 = vperm.xlu1 %3050, %v27_v23  }
  0xd8   :  { %3057 = vset.pattern.permute.xlu0 %v3214_v28 }
  0xd9   :  { %2522 = vperm.xlu0 %3057, %v30_v32  }
  0xdb   :  { %3051 = vset.pattern.permute.xlu1 %v3221_v34 }
  0xdc   :  { %2195 = vperm.xlu1 %3051, %v27_v23  }
  0xdd   :  { %2941 = vmatpush3.bf16.xpose.msra.mxu0 %v1427_v45  ;;  %2600 = vperm.xlu0 %3057, %v32_v33  }
  0xde   :  { %2959 = vmatpush3.bf16.xpose.msra.mxu1 %v1475_v47  ;;  %3022 = vmatprep.subr.msk.bf16.mxu0 %vm1317_vm1, %v3174_v46 }
  0xdf   :  { %3030 = vmatprep.subr.msk.bf16.mxu1 %vm1317_vm1, %v3175_v48 }
  0xe0   :  { %3053 = vset.pattern.permute.xlu1 %v3214_v28 }
  0xe1   :  { %2300 = vperm.xlu1 %3053, %v28_v35  }
  0xe5   :  { %2943 = vmatpush3.bf16.xpose.msra.mxu0 %v1430_v51  ;;  %2321 = vperm.xlu1 %3053, %v29_v30  }
  0xe6   :  { %2961 = vmatpush3.bf16.xpose.msra.mxu1 %v1478_v53  ;;  %3023 = vmatprep.subr.msk.bf16.mxu0 %vm1317_vm1, %v3178_v52 }
  0xe7   :  { %3031 = vmatprep.subr.msk.bf16.mxu1 %vm1317_vm1, %v3179_v54 }
  0xe9   :  { %3055 = vset.pattern.permute.xlu1 %v3217_v26 }
  0xea   :  { %2417 = vperm.xlu1 %3055, %v29_v30  }
  0xed   :  { %2945 = vmatpush3.bf16.xpose.msra.mxu0 %v1433_v57 }
  0xee   :  { %2963 = vmatpush3.bf16.xpose.msra.mxu1 %v1481_v59  ;;  %3024 = vmatprep.subr.msk.bf16.mxu0 %vm1317_vm1, %v3182_v58 }
  0xef   :  { %3032 = vmatprep.subr.msk.bf16.mxu1 %vm1317_vm1, %v3183_v60  ;;  %3056 = vset.pattern.permute.xlu1 %v3219_v29 }
  0xf0   :  { %2469 = vperm.xlu1 %3056, %v29_v30  }
  0xf4   :  { %3058 = vset.pattern.permute.xlu1 %v3214_v28 }
  0xf5   :  { %2947 = vmatpush3.bf16.xpose.msra.mxu0 %v1436_v63  ;;  %2543 = vperm.xlu1 %3058, %v31_v37  }
  0xf6   :  { %2965 = vmatpush3.bf16.xpose.msra.mxu1 %v1484_v1  ;;  %3025 = vmatprep.subr.msk.bf16.mxu0 %vm1317_vm1, %v3186_v0 }
  0xf7   :  { %3033 = vmatprep.subr.msk.bf16.mxu1 %vm1317_vm1, %v3187_v2 }
  0xf9   :  { %3059 = vset.pattern.permute.xlu1 %v3215_v24 }
  0xfa   :  { %2555 = vperm.xlu1 %3059, %v31_v37  }
  0xfd   :  { %2949 = vmatpush3.bf16.xpose.msra.mxu0 %v1439_v5 }
  0xfe   :  { %2967 = vmatpush3.bf16.xpose.msra.mxu1 %v1487_v6 }
 0x104   :  { %2951 = vmatmul.mubr.msk.bf16.vlgmr.msra.gmra.mrb[12].mxu0 %vm1317_vm1, %v3547_v42 }
 0x105   :  { %2969 = vmatmul.mubr.msk.bf16.vlgmr.msra.gmra.mrb[12].mxu1 %vm1317_vm1, %v3547_v42  ;;  %1749 = vmatprep.mubr.bf16.mxu0 %v3214_v28 }
 0x106   :  { %1790 = vmatprep.mubr.bf16.mxu1 %v3214_v28 }
 0x108   :  { %v985_v36 = vpop.permute.xlu0 %984 }
 0x10c   :  { %v990_v39 = vpop.permute.xlu0 %989 }
 0x117   :  { %v3813_v7 = vpop.f32.mrb[0].mxu0 }
 0x118   :  { %v3815_v8 = vpop.f32.mrb[0].mxu1  ;;  %v3817_v9 = vpop.f32.mrb[1].mxu0 }
 0x119   :  { %v3819_v10 = vpop.f32.mrb[1].mxu1  ;;  %v3821_v11 = vpop.f32.mrb[2].mxu0 }
 0x11a   :  { %v3823_v12 = vpop.f32.mrb[2].mxu1  ;;  %v3825_v13 = vpop.f32.mrb[3].mxu0 }
 0x11b   :  { %v3827_v14 = vpop.f32.mrb[3].mxu1 }
 0x157   :  { %v3829_v42 = vpop.f32.mrb[4].mxu0 }
 0x158   :  { %v3831_v15 = vpop.f32.mrb[4].mxu1  ;;  %v3833_v16 = vpop.f32.mrb[5].mxu0 }
 0x159   :  { %v3835_v17 = vpop.f32.mrb[5].mxu1  ;;  %v3837_v18 = vpop.f32.mrb[6].mxu0 }
 0x15a   :  { %v3839_v19 = vpop.f32.mrb[6].mxu1  ;;  %v3841_v20 = vpop.f32.mrb[7].mxu0 }
 0x15b   :  { %v3843_v21 = vpop.f32.mrb[7].mxu1 }
 0x197   :  { %v1547_v38 = vpop.f32.mrb[8].mxu0 }
 0x198   :  { %v1548_v40 = vadd.f32 %v1547_v38, %v985_v36  ;;  %v1590_v41 = vpop.f32.mrb[8].mxu1  ;;  %v1549_v43 = vpop.f32.mrb[9].mxu0 }
 0x199   :  { %v1591_v44 = vadd.f32 %v1590_v41, %v985_v36  ;;  %v1550_v45 = vadd.f32 %v1549_v43, %v985_v36  ;;  %v1592_v46 = vpop.f32.mrb[9].mxu1  ;;  %v1551_v47 = vpop.f32.mrb[10].mxu0 }
 0x19a   :  { %v1685_v48 = vmul.f32 %v1548_v40, %v3813_v7  ;;  %v1593_v49 = vadd.f32 %v1592_v46, %v985_v36  ;;  %v1552_v50 = vadd.f32 %v1551_v47, %v990_v39  ;;  %v1594_v51 = vpop.f32.mrb[10].mxu1  ;;  %v1553_v52 = vpop.f32.mrb[11].mxu0 }
 0x19b   :  { %v1687_v53 = vmul.f32 %v1591_v44, %v3815_v8  ;;  %v1686_v54 = vmul.f32 %v1550_v45, %v3817_v9  ;;  %v1595_v55 = vadd.f32 %v1594_v51, %v990_v39  ;;  %v1554_v56 = vadd.f32 %v1553_v52, %v990_v39  ;;  %v1596_v57 = vpop.f32.mrb[11].mxu1 }
 0x19c   :  { %v1688_v58 = vmul.f32 %v1593_v49, %v3819_v10  ;;  %v1693_v59 = vmul.f32 %v1552_v50, %v3821_v11  ;;  %v1597_v60 = vadd.f32 %v1596_v57, %v990_v39 }
 0x19d   :  { %v1695_v61 = vmul.f32 %v1595_v55, %v3823_v12  ;;  %v1694_v62 = vmul.f32 %v1554_v56, %v3825_v13 }
 0x19e   :  { %v1701_v63 = vpack.c.bf16 %v1693_v59, %v1685_v48  ;;  %v1696_v0 = vmul.f32 %v1597_v60, %v3827_v14 }
 0x19f   :  { %v1703_v1 = vpack.c.bf16 %v1695_v61, %v1687_v53  ;;  %v1702_v2 = vpack.c.bf16 %v1694_v62, %v1686_v54 }
 0x1a0   :  { %v1704_v3 = vpack.c.bf16 %v1696_v0, %v1688_v58 }
 0x1a1   :  { %1717 = vmatprep.subr.bf16.mxu0 %v1702_v2 }
 0x1a2   :  { %1758 = vmatprep.subr.bf16.mxu1 %v1704_v3  ;;  %1718 = vmatpush1.bf16.msra.mxu0 %v1701_v63 }
 0x1a3   :  { %1759 = vmatpush1.bf16.msra.mxu1 %v1703_v1 }
 0x1a5   :  { %2822 = vmatmul.mubr.msk.bf16.vlgmr.msra.gmra.mrb[16].mxu0 %vm614_vm0, %v21_v4 }
 0x1a6   :  { %2823 = vmatmul.mubr.msk.bf16.vlgmr.msra.gmra.mrb[16].mxu1 %vm614_vm0, %v21_v4  ;;  %1831 = vmatprep.mubr.bf16.mxu0 %v3214_v28 }
 0x1a7   :  { %1872 = vmatprep.mubr.bf16.mxu1 %v3214_v28 }
 0x1d7   :  { %v1633_v5 = vpop.f32.mrb[12].mxu0 }
 0x1d8   :  { %v1634_v6 = vadd.f32 %v1633_v5, %v985_v36  ;;  %v1676_v7 = vpop.f32.mrb[12].mxu1  ;;  %v1635_v8 = vpop.f32.mrb[13].mxu0 }
 0x1d9   :  { %v1677_v9 = vadd.f32 %v1676_v7, %v985_v36  ;;  %v1636_v10 = vadd.f32 %v1635_v8, %v985_v36  ;;  %v1678_v11 = vpop.f32.mrb[13].mxu1  ;;  %v1637_v12 = vpop.f32.mrb[14].mxu0 }
 0x1da   :  { %v1689_v13 = vmul.f32 %v1634_v6, %v3829_v42  ;;  %v1679_v14 = vadd.f32 %v1678_v11, %v985_v36  ;;  %v1638_v22 = vadd.f32 %v1637_v12, %v990_v39  ;;  %v1680_v23 = vpop.f32.mrb[14].mxu1  ;;  %v1639_v24 = vpop.f32.mrb[15].mxu0 }
 0x1db   :  { %v1691_v25 = vmul.f32 %v1677_v9, %v3831_v15  ;;  %v1690_v26 = vmul.f32 %v1636_v10, %v3833_v16  ;;  %v1681_v27 = vadd.f32 %v1680_v23, %v990_v39  ;;  %v1640_v28 = vadd.f32 %v1639_v24, %v990_v39  ;;  %v1682_v29 = vpop.f32.mrb[15].mxu1  ;;  %v3894_v16 = vpop.permute.xlu1 %1711 }
 0x1dc   :  { %v1692_v30 = vmul.f32 %v1679_v14, %v3835_v17  ;;  %v1697_v31 = vmul.f32 %v1638_v22, %v3837_v18  ;;  %v1683_v32 = vadd.f32 %v1682_v29, %v990_v39  ;;  %v1894_v18 = vlaneseq  ;;  %v3958_v9 = vpop.permute.xlu0 %1935 }
 0x1dd   :  { %v1699_v33 = vmul.f32 %v1681_v27, %v3839_v19  ;;  %v1698_v42 = vmul.f32 %v1640_v28, %v3841_v20 }
 0x1de   :  { %v1705_v34 = vpack.c.bf16 %v1697_v31, %v1689_v13  ;;  %v1700_v35 = vmul.f32 %v1683_v32, %v3843_v21  ;;  %v3900_v20 = vshrl.u32 %v1894_v18, 7 }
 0x1df   :  { %v1707_v36 = vpack.c.bf16 %v1699_v33, %v1691_v25  ;;  %v1706_v37 = vpack.c.bf16 %v1698_v42, %v1690_v26  ;;  %v3896_v17 = vpop.permute.xlu1 %1891 }
 0x1e0   :  { %v1708_v15 = vpack.c.bf16 %v1700_v35, %v1692_v30  ;;  %v3906_v41 = vsub.s32 0, %v3900_v20  ;;  %v3909_v44 = vsub.s32 2, %v3900_v20  ;;  %v3912_v45 = vsub.s32 1, %v3900_v20 }
 0x1e1   :  { %1799 = vmatprep.subr.bf16.mxu0 %v1706_v37  ;;  %v3917_v49 = vsub.s32 3, %v3900_v20  ;;  %v3923_v53 = vsub.s32 5, %v3900_v20  ;;  %v3926_v54 = vsub.s32 4, %v3900_v20  ;;  %v3933_v59 = vsub.s32 6, %v3900_v20 }
 0x1e2   :  { %1840 = vmatprep.subr.bf16.mxu1 %v1708_v15  ;;  %1800 = vmatpush1.bf16.msra.mxu0 %v1705_v34  ;;  %v3936_v60 = vsub.s32 7, %v3900_v20 }
 0x1e3   :  { %1841 = vmatpush1.bf16.msra.mxu1 %v1707_v36  ;;  %v3898_v19 = vpop.permute.xlu1 %1987 }
 0x1e5   :  { %2824 = vmatmul.mubr.msk.bf16.vlgmr.msra.gmra.mrb[20].mxu0 %vm614_vm0, %v21_v4 }
 0x1e6   :  { %2825 = vmatmul.mubr.msk.bf16.vlgmr.msra.gmra.mrb[20].mxu1 %vm614_vm0, %v21_v4 }
 0x1e7   :  { %v3902_v38 = vpop.permute.xlu1 %2039 }
 0x1eb   :  { %v3966_v22 = vpop.permute.xlu1 %2143 }
 0x278   :  { %v1751_v21 = vpop.f32.mrb[16].mxu0 }
 0x279   :  { %v1752_v39 = vadd.f32 %v1751_v21, %v3894_v16  ;;  %v1792_v40 = vpop.f32.mrb[16].mxu1  ;;  %v1753_v43 = vpop.f32.mrb[17].mxu0 }
 0x27a   :  { %v1793_v46 = vadd.f32 %v1792_v40, %v3894_v16  ;;  %v1754_v47 = vadd.f32 %v1753_v43, %v3894_v16  ;;  %v1794_v48 = vpop.f32.mrb[17].mxu1  ;;  %v1755_v50 = vpop.f32.mrb[18].mxu0 }
 0x27b   :  { %v3919_v51 = vmax.f32 %v1752_v39, 0.0  ;;  %v1795_v52 = vadd.f32 %v1794_v48, %v3894_v16  ;;  %v1796_v55 = vpop.f32.mrb[18].mxu1  ;;  %v1756_v56 = vpop.f32.mrb[19].mxu0 }
 0x27c   :  { %v3928_v57 = vmax.f32 %v1793_v46, 0.0  ;;  %v3930_v58 = vmax.f32 %v1754_v47, 0.0  ;;  %v1797_v61 = vpop.f32.mrb[19].mxu1  ;;  %v3996_v48 = vpop.permute.xlu1 %2195 }
 0x27d   :  { %v1897_v62 = vrot.slane %v3919_v51, %v3906_v41  ;;  %v3940_v63 = vmax.f32 %v1795_v52, 0.0  ;;  %v1993_v0 = vrot.slane %v3919_v51, %v3909_v44  ;;  %v1941_v1 = vrot.slane %v3919_v51, %v3912_v45 }
 0x27e   :  { %v1905_v2 = vrot.slane %v3928_v57, %v3906_v41  ;;  %v1997_v3 = vrot.slane %v3930_v58, %v3909_v44  ;;  %v2001_v4 = vrot.slane %v3928_v57, %v3909_v44  ;;  %v1901_v5 = vrot.slane %v3930_v58, %v3906_v41 }
 0x27f   :  { %v1926_v6 = vmul.f32 %v1897_v62, %v3896_v17  ;;  %v2005_v7 = vrot.slane %v3940_v63, %v3909_v44  ;;  %v2022_v8 = vmul.f32 %v1993_v0, %v3898_v19  ;;  %v1909_v10 = vrot.slane %v3940_v63, %v3906_v41 }
 0x280   :  { %v1928_v11 = vmul.f32 %v1905_v2, %v3896_v17  ;;  %v2023_v12 = vmul.f32 %v1997_v3, %v3898_v19  ;;  %v2024_v13 = vmul.f32 %v2001_v4, %v3898_v19  ;;  %v1927_v14 = vmul.f32 %v1901_v5, %v3896_v17 }
 0x281   :  { %v2025_v23 = vmul.f32 %v2005_v7, %v3898_v19  ;;  %v1929_v24 = vmul.f32 %v1909_v10, %v3896_v17  ;;  %v1945_v25 = vrot.slane %v3930_v58, %v3912_v45  ;;  %v1949_v26 = vrot.slane %v3928_v57, %v3912_v45 }
 0x282   :  { %v1953_v27 = vrot.slane %v3940_v63, %v3912_v45  ;;  %v1970_v28 = vmul.f32 %v1941_v1, %v3958_v9  ;;  %v2045_v29 = vrot.slane %v3919_v51, %v3917_v49  ;;  %v2049_v30 = vrot.slane %v3930_v58, %v3917_v49 }
 0x283   :  { %v1971_v31 = vmul.f32 %v1945_v25, %v3958_v9  ;;  %v1972_v32 = vmul.f32 %v1949_v26, %v3958_v9  ;;  %v2053_v33 = vrot.slane %v3928_v57, %v3917_v49  ;;  %v2057_v42 = vrot.slane %v3940_v63, %v3917_v49 }
 0x284   :  { %v1973_v34 = vmul.f32 %v1953_v27, %v3958_v9  ;;  %v1978_v35 = vadd.f32 %v1970_v28, %v1926_v6  ;;  %v2074_v36 = vmul.f32 %v2045_v29, %v3902_v38  ;;  %v2075_v37 = vmul.f32 %v2049_v30, %v3902_v38  ;;  %v4006_v6 = vpop.permute.xlu0 %2091  ;;  %v4027_v28 = vpop.permute.xlu1 %2300 }
 0x285   :  { %v1979_v15 = vadd.f32 %v1971_v31, %v1927_v14  ;;  %v1980_v18 = vadd.f32 %v1972_v32, %v1928_v11  ;;  %v2076_v21 = vmul.f32 %v2053_v33, %v3902_v38  ;;  %v2077_v39 = vmul.f32 %v2057_v42, %v3902_v38 }
 0x286   :  { %v1981_v40 = vadd.f32 %v1973_v34, %v1929_v24  ;;  %v2030_v43 = vadd.f32 %v2022_v8, %v1978_v35  ;;  %v2149_v46 = vrot.slane %v3919_v51, %v3923_v53  ;;  %v2153_v47 = vrot.slane %v3930_v58, %v3923_v53 }
 0x287   :  { %v2031_v50 = vadd.f32 %v2023_v12, %v1979_v15  ;;  %v2032_v52 = vadd.f32 %v2024_v13, %v1980_v18  ;;  %v2157_v55 = vrot.slane %v3928_v57, %v3923_v53  ;;  %v2161_v56 = vrot.slane %v3940_v63, %v3923_v53 }
 0x288   :  { %v2033_v61 = vadd.f32 %v2025_v23, %v1981_v40  ;;  %v2082_v62 = vadd.f32 %v2074_v36, %v2030_v43  ;;  %v2178_v0 = vmul.f32 %v2149_v46, %v3966_v22  ;;  %v2179_v1 = vmul.f32 %v2153_v47, %v3966_v22  ;;  %v4034_v36 = vpop.permute.xlu0 %2247 }
 0x289   :  { %v2083_v2 = vadd.f32 %v2075_v37, %v2031_v50  ;;  %v2084_v3 = vadd.f32 %v2076_v21, %v2032_v52  ;;  %v2180_v4 = vmul.f32 %v2157_v55, %v3966_v22  ;;  %v2181_v5 = vmul.f32 %v2161_v56, %v3966_v22 }
 0x28a   :  { %v2085_v7 = vadd.f32 %v2077_v39, %v2033_v61  ;;  %v2097_v8 = vrot.slane %v3919_v51, %v3926_v54  ;;  %v2101_v10 = vrot.slane %v3930_v58, %v3926_v54  ;;  %v2105_v11 = vrot.slane %v3928_v57, %v3926_v54 }
 0x28b   :  { %v2109_v12 = vrot.slane %v3940_v63, %v3926_v54  ;;  %v2201_v13 = vrot.slane %v3919_v51, %v3933_v59  ;;  %v2205_v14 = vrot.slane %v3930_v58, %v3933_v59  ;;  %v2209_v23 = vrot.slane %v3928_v57, %v3933_v59 }
 0x28c   :  { %v2126_v24 = vmul.f32 %v2097_v8, %v4006_v6  ;;  %v2127_v25 = vmul.f32 %v2101_v10, %v4006_v6  ;;  %v2128_v26 = vmul.f32 %v2105_v11, %v4006_v6  ;;  %v2213_v27 = vrot.slane %v3940_v63, %v3933_v59 }
 0x28d   :  { %v2129_v29 = vmul.f32 %v2109_v12, %v4006_v6  ;;  %v2230_v30 = vmul.f32 %v2201_v13, %v3996_v48  ;;  %v2231_v31 = vmul.f32 %v2205_v14, %v3996_v48  ;;  %v2232_v32 = vmul.f32 %v2209_v23, %v3996_v48 }
 0x28e   :  { %v2134_v33 = vadd.f32 %v2126_v24, %v2082_v62  ;;  %v2135_v42 = vadd.f32 %v2127_v25, %v2083_v2  ;;  %v2136_v34 = vadd.f32 %v2128_v26, %v2084_v3  ;;  %v2233_v35 = vmul.f32 %v2213_v27, %v3996_v48  ;;  %v4048_v62 = vpop.permute.xlu1 %2321 }
 0x28f   :  { %v2137_v37 = vadd.f32 %v2129_v29, %v2085_v7  ;;  %v2253_v15 = vrot.slane %v3919_v51, %v3936_v60  ;;  %v2257_v18 = vrot.slane %v3930_v58, %v3936_v60  ;;  %v2261_v21 = vrot.slane %v3928_v57, %v3936_v60 }
 0x290   :  { %v2186_v39 = vadd.f32 %v2178_v0, %v2134_v33  ;;  %v2187_v40 = vadd.f32 %v2179_v1, %v2135_v42  ;;  %v2188_v43 = vadd.f32 %v2180_v4, %v2136_v34  ;;  %v2265_v46 = vrot.slane %v3940_v63, %v3936_v60 }
 0x291   :  { %v2189_v47 = vadd.f32 %v2181_v5, %v2137_v37  ;;  %v2282_v50 = vmul.f32 %v2253_v15, %v4034_v36  ;;  %v2283_v52 = vmul.f32 %v2257_v18, %v4034_v36  ;;  %v2284_v55 = vmul.f32 %v2261_v21, %v4034_v36  ;;  %v4072_v18 = vpop.permute.xlu0 %2365 }
 0x292   :  { %v2238_v51 = vadd.f32 %v2230_v30, %v2186_v39  ;;  %v2239_v56 = vadd.f32 %v2231_v31, %v2187_v40  ;;  %v2240_v61 = vadd.f32 %v2232_v32, %v2188_v43  ;;  %v2285_v58 = vmul.f32 %v2265_v46, %v4034_v36  ;;  %v4054_v12 = vpop.permute.xlu1 %2417 }
 0x293   :  { %v2241_v57 = vadd.f32 %v2233_v35, %v2189_v47 }
 0x294   :  { %v2290_v0 = vadd.f32 %v2282_v50, %v2238_v51  ;;  %v2291_v1 = vadd.f32 %v2283_v52, %v2239_v56  ;;  %v2292_v2 = vadd.f32 %v2284_v55, %v2240_v61 }
 0x295   :  { %v2293_v3 = vadd.f32 %v2285_v58, %v2241_v57 }
 0x296   :  { %v2303_v63 = vadd.f32 %v4027_v28, %v2290_v0  ;;  %v2304_v4 = vadd.f32 %v4027_v28, %v2291_v1  ;;  %v2305_v5 = vadd.f32 %v4027_v28, %v2292_v2  ;;  %v4078_v46 = vpop.permute.xlu1 %2469 }
 0x297   :  { %v2306_v7 = vadd.f32 %v4027_v28, %v2293_v3 }
 0x298   :  { %v2311_v8 = vmax.f32 %v2303_v63, 0.0  ;;  %v2312_v10 = vmax.f32 %v2304_v4, 0.0  ;;  %v2313_v11 = vmax.f32 %v2305_v5, 0.0 }
 0x299   :  { %v2314_v13 = vmax.f32 %v2306_v7, 0.0 }
 0x29a   :  { %v2327_v14 = vrot.slane %v2311_v8, %v3906_v41  ;;  %v2331_v23 = vrot.slane %v2312_v10, %v3906_v41  ;;  %v2335_v24 = vrot.slane %v2313_v11, %v3906_v41  ;;  %v2423_v25 = vrot.slane %v2311_v8, %v3909_v44 }
 0x29b   :  { %v2339_v26 = vrot.slane %v2314_v13, %v3906_v41  ;;  %v2427_v27 = vrot.slane %v2312_v10, %v3909_v44  ;;  %v2431_v29 = vrot.slane %v2313_v11, %v3909_v44  ;;  %v2435_v30 = vrot.slane %v2314_v13, %v3909_v44 }
 0x29c   :  { %v2356_v31 = vmul.f32 %v2327_v14, %v4048_v62  ;;  %v2357_v32 = vmul.f32 %v2331_v23, %v4048_v62  ;;  %v2358_v33 = vmul.f32 %v2335_v24, %v4048_v62  ;;  %v2452_v42 = vmul.f32 %v2423_v25, %v4054_v12  ;;  %v4094_v14 = vpop.permute.xlu1 %2543 }
 0x29d   :  { %v2359_v34 = vmul.f32 %v2339_v26, %v4048_v62  ;;  %v2453_v35 = vmul.f32 %v2427_v27, %v4054_v12  ;;  %v2454_v37 = vmul.f32 %v2431_v29, %v4054_v12  ;;  %v2455_v15 = vmul.f32 %v2435_v30, %v4054_v12 }
 0x29e   :  { %v2371_v21 = vrot.slane %v2311_v8, %v3912_v45  ;;  %v2375_v39 = vrot.slane %v2312_v10, %v3912_v45  ;;  %v2379_v40 = vrot.slane %v2313_v11, %v3912_v45  ;;  %v2383_v43 = vrot.slane %v2314_v13, %v3912_v45 }
 0x29f   :  { %v2475_v47 = vrot.slane %v2311_v8, %v3917_v49  ;;  %v2479_v50 = vrot.slane %v2312_v10, %v3917_v49  ;;  %v2483_v52 = vrot.slane %v2313_v11, %v3917_v49  ;;  %v2487_v55 = vrot.slane %v2314_v13, %v3917_v49  ;;  %v4092_v13 = vpop.permute.xlu0 %2522 }
 0x2a0   :  { %v2400_v51 = vmul.f32 %v2371_v21, %v4072_v18  ;;  %v2401_v56 = vmul.f32 %v2375_v39, %v4072_v18  ;;  %v2402_v61 = vmul.f32 %v2379_v40, %v4072_v18  ;;  %v2403_v58 = vmul.f32 %v2383_v43, %v4072_v18 }
 0x2a1   :  { %v2504_v57 = vmul.f32 %v2475_v47, %v4078_v46  ;;  %v2505_v0 = vmul.f32 %v2479_v50, %v4078_v46  ;;  %v2506_v1 = vmul.f32 %v2483_v52, %v4078_v46  ;;  %v2507_v2 = vmul.f32 %v2487_v55, %v4078_v46 }
 0x2a2   :  { %v2408_v3 = vadd.f32 %v2400_v51, %v2356_v31  ;;  %v2409_v63 = vadd.f32 %v2401_v56, %v2357_v32  ;;  %v2410_v4 = vadd.f32 %v2402_v61, %v2358_v33  ;;  %v2411_v5 = vadd.f32 %v2403_v58, %v2359_v34 }
 0x2a3   :  { %v3222_v27 = vmov 1966171168  }
 0x2a4   :  { %v2460_v7 = vadd.f32 %v2452_v42, %v2408_v3  ;;  %v2461_v8 = vadd.f32 %v2453_v35, %v2409_v63  ;;  %v2462_v10 = vadd.f32 %v2454_v37, %v2410_v4  ;;  %v2463_v11 = vadd.f32 %v2455_v15, %v2411_v5  ;;  %v4100_v15 = vpop.permute.xlu1 %2555 }
 0x2a5   :  { %v2624_v29 = vunpack.c.l.s4 %v3222_v27 }
 0x2a6   :  { %v2512_v23 = vadd.f32 %v2504_v57, %v2460_v7  ;;  %v2513_v24 = vadd.f32 %v2505_v0, %v2461_v8  ;;  %v2514_v25 = vadd.f32 %v2506_v1, %v2462_v10  ;;  %v2515_v26 = vadd.f32 %v2507_v2, %v2463_v11  ;;  %v4110_v0 = vpop.permute.xlu0 %2600 }
 0x2a7   :  { %v2625_v21 = vunpack.c.0.s8 %v2624_v29 }
 0x2a8   :  { %v2525_v30 = vadd.f32 %v4092_v13, %v2512_v23  ;;  %v2526_v31 = vadd.f32 %v4092_v13, %v2513_v24  ;;  %v2527_v32 = vadd.f32 %v4092_v13, %v2514_v25  ;;  %v2528_v33 = vadd.f32 %v4092_v13, %v2515_v26 }
 0x2a9   :  { %v4113_v4 = vsub.s32 %v2625_v21, %v3900_v20 }
 0x2aa   :  { %v2533_v42 = vmax.f32 %v2525_v30, 0.0  ;;  %v2534_v34 = vmax.f32 %v2526_v31, 0.0  ;;  %v2535_v35 = vmax.f32 %v2527_v32, 0.0  ;;  %v2536_v37 = vmax.f32 %v2528_v33, 0.0 }
 0x2ac   :  { %v2566_v39 = vrot.slane %v2533_v42, 1  ;;  %v2567_v40 = vrot.slane %v2534_v34, 1  ;;  %v2568_v43 = vrot.slane %v2535_v35, 1  ;;  %v2569_v47 = vrot.slane %v2536_v37, 1 }
 0x2ad   :  { %v2546_v50 = vmul.f32 %v4094_v14, %v2533_v42  ;;  %v2547_v52 = vmul.f32 %v4094_v14, %v2534_v34  ;;  %v2548_v55 = vmul.f32 %v4094_v14, %v2535_v35  ;;  %v2549_v51 = vmul.f32 %v4094_v14, %v2536_v37 }
 0x2ae   :  { %v2582_v56 = vmul.f32 %v2566_v39, %v4100_v15  ;;  %v2583_v61 = vmul.f32 %v2567_v40, %v4100_v15  ;;  %v2584_v58 = vmul.f32 %v2568_v43, %v4100_v15  ;;  %v2585_v57 = vmul.f32 %v2569_v47, %v4100_v15 }
 0x2b0   :  { %v2590_v1 = vadd.f32 %v2582_v56, %v2546_v50  ;;  %v2591_v2 = vadd.f32 %v2583_v61, %v2547_v52  ;;  %v2592_v3 = vadd.f32 %v2584_v58, %v2548_v55  ;;  %v2593_v63 = vadd.f32 %v2585_v57, %v2549_v51 }
 0x2b2   :  { %v2603_v5 = vadd.f32 %v4110_v0, %v2590_v1  ;;  %v2604_v7 = vadd.f32 %v4110_v0, %v2591_v2  ;;  %v2605_v8 = vadd.f32 %v4110_v0, %v2592_v3  ;;  %v2606_v10 = vadd.f32 %v4110_v0, %v2593_v63 }
 0x2b4   :  { %v2619_v11 = vcombine.low %v2603_v5, %v2604_v7  ;;  %v2620_v23 = vcombine.low %v2605_v8, %v2606_v10 }
 0x2b6   :  { %v4120_v24 = vrot.slane %v2619_v11, %v4113_v4  ;;  %v4123_v25 = vrot.slane %v2620_v23, %v4113_v4 }
 0x2b8   :  { %v1833_v26 = vpop.f32.mrb[20].mxu0  ;;  %v2651_v20 = vcombine.low %v4120_v24, %v4123_v25 }
 0x2b9   :  { %v1834_v27 = vadd.f32 %v1833_v26, %v3894_v16  ;;  %v1874_v29 = vpop.f32.mrb[20].mxu1  ;;  %v1835_v30 = vpop.f32.mrb[21].mxu0 }
 0x2ba   :  { %v1875_v31 = vadd.f32 %v1874_v29, %v3894_v16  ;;  %v1876_v32 = vpop.f32.mrb[21].mxu1  ;;  %v1837_v33 = vpop.f32.mrb[22].mxu0  ;;  %v1836_v21 = vadd.f32 %v1835_v30, %v3894_v16 }
 0x2bb   :  { %v1885_v42 = vmax.f32 %v1834_v27, 0.0  ;;  %v1878_v34 = vpop.f32.mrb[22].mxu1  ;;  %v1838_v35 = vpop.f32.mrb[23].mxu0  ;;  %v1877_v1 = vadd.f32 %v1876_v32, %v3894_v16 }
 0x2bc   :  { %v1887_v37 = vmax.f32 %v1875_v31, 0.0  ;;  %v1879_v39 = vpop.f32.mrb[23].mxu1  ;;  %v4140_v57 = vmax.f32 %v1836_v21, 0.0 }
 0x2bd   :  { %v1913_v40 = vrot.slane %v1885_v42, %v3906_v41  ;;  %v1957_v43 = vrot.slane %v1885_v42, %v3912_v45  ;;  %v2009_v47 = vrot.slane %v1885_v42, %v3909_v44  ;;  %v2061_v50 = vrot.slane %v1885_v42, %v3917_v49 }
 0x2be   :  { %v2113_v51 = vrot.slane %v1885_v42, %v3926_v54  ;;  %v2165_v56 = vrot.slane %v1885_v42, %v3923_v53  ;;  %v2217_v61 = vrot.slane %v1885_v42, %v3933_v59  ;;  %v1921_v58 = vrot.slane %v1887_v37, %v3906_v41 }
 0x2bf   :  { %v1930_v52 = vmul.f32 %v1913_v40, %v3896_v17  ;;  %v1974_v55 = vmul.f32 %v1957_v43, %v3958_v9  ;;  %v2026_v3 = vmul.f32 %v2009_v47, %v3898_v19  ;;  %v1965_v63 = vrot.slane %v1887_v37, %v3912_v45 }
 0x2c0   :  { %v2017_v5 = vrot.slane %v1887_v37, %v3909_v44  ;;  %v2078_v7 = vmul.f32 %v2061_v50, %v3902_v38  ;;  %v2269_v8 = vrot.slane %v1885_v42, %v3936_v60  ;;  %v1932_v10 = vmul.f32 %v1921_v58, %v3896_v17 }
 0x2c1   :  { %v1982_v2 = vadd.f32 %v1974_v55, %v1930_v52  ;;  %v2069_v11 = vrot.slane %v1887_v37, %v3917_v49  ;;  %v2130_v26 = vmul.f32 %v2113_v51, %v4006_v6  ;;  %v2182_v16 = vmul.f32 %v2165_v56, %v3966_v22 }
 0x2c2   :  { %v1976_v27 = vmul.f32 %v1965_v63, %v3958_v9  ;;  %v2234_v29 = vmul.f32 %v2217_v61, %v3996_v48  ;;  %v2121_v30 = vrot.slane %v1887_v37, %v3926_v54  ;;  %v2173_v31 = vrot.slane %v1887_v37, %v3923_v53 }
 0x2c3   :  { %v2034_v23 = vadd.f32 %v2026_v3, %v1982_v2  ;;  %v2225_v32 = vrot.slane %v1887_v37, %v3933_v59  ;;  %v2028_v34 = vmul.f32 %v2017_v5, %v3898_v19  ;;  %v1917_v35 = vrot.slane %v4140_v57, %v3906_v41 }
 0x2c4   :  { %v1984_v42 = vadd.f32 %v1976_v27, %v1932_v10  ;;  %v2080_v21 = vmul.f32 %v2069_v11, %v3902_v38  ;;  %v2277_v39 = vrot.slane %v1887_v37, %v3936_v60  ;;  %v1961_v40 = vrot.slane %v4140_v57, %v3912_v45 }
 0x2c5   :  { %v2086_v33 = vadd.f32 %v2078_v7, %v2034_v23  ;;  %v2013_v43 = vrot.slane %v4140_v57, %v3909_v44  ;;  %v1931_v52 = vmul.f32 %v1917_v35, %v3896_v17  ;;  %v2065_v55 = vrot.slane %v4140_v57, %v3917_v49 }
 0x2c6   :  { %v2036_v50 = vadd.f32 %v2028_v34, %v1984_v42  ;;  %v2132_v51 = vmul.f32 %v2121_v30, %v4006_v6  ;;  %v2184_v56 = vmul.f32 %v2173_v31, %v3966_v22  ;;  %v2236_v61 = vmul.f32 %v2225_v32, %v3996_v48 }
 0x2c7   :  { %v2138_v47 = vadd.f32 %v2130_v26, %v2086_v33  ;;  %v1975_v37 = vmul.f32 %v1961_v40, %v3958_v9  ;;  %v2286_v3 = vmul.f32 %v2269_v8, %v4034_v36  ;;  %v2117_v63 = vrot.slane %v4140_v57, %v3926_v54 }
 0x2c8   :  { %v2088_v58 = vadd.f32 %v2080_v21, %v2036_v50  ;;  %v2288_v5 = vmul.f32 %v2277_v39, %v4034_v36  ;;  %v2027_v10 = vmul.f32 %v2013_v43, %v3898_v19  ;;  %v1888_v11 = vmax.f32 %v1877_v1, 0.0 }
 0x2c9   :  { %v2190_v2 = vadd.f32 %v2182_v16, %v2138_v47  ;;  %v1983_v7 = vadd.f32 %v1975_v37, %v1931_v52  ;;  %v2079_v27 = vmul.f32 %v2065_v55, %v3902_v38  ;;  %v2169_v30 = vrot.slane %v4140_v57, %v3923_v53 }
 0x2ca   :  { %v2140_v23 = vadd.f32 %v2132_v51, %v2088_v58  ;;  %v1925_v16 = vrot.slane %v1888_v11, %v3906_v41  ;;  %v1969_v8 = vrot.slane %v1888_v11, %v3912_v45  ;;  %v2021_v32 = vrot.slane %v1888_v11, %v3909_v44 }
 0x2cb   :  { %v2242_v26 = vadd.f32 %v2234_v29, %v2190_v2  ;;  %v2035_v31 = vadd.f32 %v2027_v10, %v1983_v7  ;;  %v2131_v34 = vmul.f32 %v2117_v63, %v4006_v6  ;;  %v2221_v1 = vrot.slane %v4140_v57, %v3933_v59 }
 0x2cc   :  { %v2192_v33 = vadd.f32 %v2184_v56, %v2140_v23  ;;  %v1933_v35 = vmul.f32 %v1925_v16, %v3896_v17  ;;  %v1977_v21 = vmul.f32 %v1969_v8, %v3958_v9  ;;  %v2073_v39 = vrot.slane %v1888_v11, %v3917_v49 }
 0x2cd   :  { %v2294_v42 = vadd.f32 %v2286_v3, %v2242_v26  ;;  %v2087_v29 = vadd.f32 %v2079_v27, %v2035_v31  ;;  %v2273_v47 = vrot.slane %v4140_v57, %v3936_v60  ;;  %v2125_v50 = vrot.slane %v1888_v11, %v3926_v54 }
 0x2ce   :  { %v2244_v40 = vadd.f32 %v2236_v61, %v2192_v33  ;;  %v2183_v55 = vmul.f32 %v2169_v30, %v3966_v22  ;;  %v1985_v51 = vadd.f32 %v1977_v21, %v1933_v35  ;;  %v2029_v56 = vmul.f32 %v2021_v32, %v3898_v19 }
 0x2cf   :  { %v2307_v43 = vadd.f32 %v4027_v28, %v2294_v42  ;;  %v2139_v52 = vadd.f32 %v2131_v34, %v2087_v29  ;;  %v2235_v9 = vmul.f32 %v2221_v1, %v3996_v48  ;;  %v2177_v58 = vrot.slane %v1888_v11, %v3923_v53 }
 0x2d0   :  { %v2296_v37 = vadd.f32 %v2288_v5, %v2244_v40  ;;  %v2037_v61 = vadd.f32 %v2029_v56, %v1985_v51  ;;  %v2081_v2 = vmul.f32 %v2073_v39, %v3902_v38  ;;  %v2229_v3 = vrot.slane %v1888_v11, %v3933_v59 }
 0x2d1   :  { %v2315_v17 = vmax.f32 %v2307_v43, 0.0  ;;  %v2191_v57 = vadd.f32 %v2183_v55, %v2139_v52  ;;  %v2133_v7 = vmul.f32 %v2125_v50, %v4006_v6  ;;  %v2287_v19 = vmul.f32 %v2273_v47, %v4034_v36 }
 0x2d2   :  { %v2309_v54 = vadd.f32 %v4027_v28, %v2296_v37  ;;  %v2089_v5 = vadd.f32 %v2081_v2, %v2037_v61  ;;  %v2185_v59 = vmul.f32 %v2177_v58, %v3966_v22  ;;  %v2281_v27 = vrot.slane %v1888_v11, %v3936_v60 }
 0x2d3   :  { %v2343_v63 = vrot.slane %v2315_v17, %v3906_v41  ;;  %v2243_v10 = vadd.f32 %v2235_v9, %v2191_v57  ;;  %v2439_v23 = vrot.slane %v2315_v17, %v3909_v44  ;;  %v2387_v53 = vrot.slane %v2315_v17, %v3912_v45 }
 0x2d4   :  { %v2317_v26 = vmax.f32 %v2309_v54, 0.0  ;;  %v2141_v30 = vadd.f32 %v2133_v7, %v2089_v5  ;;  %v2237_v31 = vmul.f32 %v2229_v3, %v3996_v48  ;;  %v2491_v42 = vrot.slane %v2315_v17, %v3917_v49 }
 0x2d5   :  { %v2360_v38 = vmul.f32 %v2343_v63, %v4048_v62  ;;  %v2295_v16 = vadd.f32 %v2287_v19, %v2243_v10  ;;  %v2404_v6 = vmul.f32 %v2387_v53, %v4072_v18  ;;  %v2456_v22 = vmul.f32 %v2439_v23, %v4054_v12 }
 0x2d6   :  { %v2351_v8 = vrot.slane %v2317_v26, %v3906_v41  ;;  %v2447_v32 = vrot.slane %v2317_v26, %v3909_v44  ;;  %v2395_v33 = vrot.slane %v2317_v26, %v3912_v45  ;;  %v2193_v34 = vadd.f32 %v2185_v59, %v2141_v30 }
 0x2d7   :  { %v2308_v1 = vadd.f32 %v4027_v28, %v2295_v16  ;;  %v2412_v60 = vadd.f32 %v2404_v6, %v2360_v38  ;;  %v2499_v29 = vrot.slane %v2317_v26, %v3917_v49  ;;  %v2289_v21 = vmul.f32 %v2281_v27, %v4034_v36 }
 0x2d8   :  { %v2362_v11 = vmul.f32 %v2351_v8, %v4048_v62  ;;  %v2406_v48 = vmul.f32 %v2395_v33, %v4072_v18  ;;  %v2245_v35 = vadd.f32 %v2237_v31, %v2193_v34  ;;  %v2458_v43 = vmul.f32 %v2447_v32, %v4054_v12 }
 0x2d9   :  { %v2316_v39 = vmax.f32 %v2308_v1, 0.0  ;;  %v2464_v40 = vadd.f32 %v2456_v22, %v2412_v60  ;;  %v2508_v50 = vmul.f32 %v2491_v42, %v4078_v46  ;;  %v2510_v37 = vmul.f32 %v2499_v29, %v4078_v46 }
 0x2da   :  { %v2414_v47 = vadd.f32 %v2406_v48, %v2362_v11  ;;  %v2297_v52 = vadd.f32 %v2289_v21, %v2245_v35 }
 0x2db   :  { %v2347_v55 = vrot.slane %v2316_v39, %v3906_v41  ;;  %v2391_v51 = vrot.slane %v2316_v39, %v3912_v45  ;;  %v2443_v56 = vrot.slane %v2316_v39, %v3909_v44  ;;  %v2516_v9 = vadd.f32 %v2508_v50, %v2464_v40 }
 0x2dc   :  { %v2466_v17 = vadd.f32 %v2458_v43, %v2414_v47  ;;  %v2310_v36 = vadd.f32 %v4027_v28, %v2297_v52  ;;  %v2495_v2 = vrot.slane %v2316_v39, %v3917_v49 }
 0x2dd   :  { %v2361_v58 = vmul.f32 %v2347_v55, %v4048_v62  ;;  %v2405_v61 = vmul.f32 %v2391_v51, %v4072_v18  ;;  %v2529_v57 = vadd.f32 %v4092_v13, %v2516_v9  ;;  %v2457_v7 = vmul.f32 %v2443_v56, %v4054_v12 }
 0x2de   :  { %v2518_v3 = vadd.f32 %v2510_v37, %v2466_v17  ;;  %v2318_v54 = vmax.f32 %v2310_v36, 0.0  ;;  %v2509_v53 = vmul.f32 %v2495_v2, %v4078_v46 }
 0x2df   :  { %v2413_v63 = vadd.f32 %v2405_v61, %v2361_v58  ;;  %v2537_v5 = vmax.f32 %v2529_v57, 0.0 }
 0x2e0   :  { %v2531_v19 = vadd.f32 %v4092_v13, %v2518_v3  ;;  %v2451_v10 = vrot.slane %v2318_v54, %v3909_v44  ;;  %v2355_v28 = vrot.slane %v2318_v54, %v3906_v41  ;;  %v2399_v23 = vrot.slane %v2318_v54, %v3912_v45 }
 0x2e1   :  { %v2465_v26 = vadd.f32 %v2457_v7, %v2413_v63  ;;  %v2570_v38 = vrot.slane %v2537_v5, 1  ;;  %v2503_v30 = vrot.slane %v2318_v54, %v3917_v49 }
 0x2e2   :  { %v2363_v59 = vmul.f32 %v2355_v28, %v4048_v62  ;;  %v2407_v27 = vmul.f32 %v2399_v23, %v4072_v18  ;;  %v2539_v31 = vmax.f32 %v2531_v19, 0.0  ;;  %v2459_v6 = vmul.f32 %v2451_v10, %v4054_v12 }
 0x2e3   :  { %v2517_v16 = vadd.f32 %v2509_v53, %v2465_v26  ;;  %v2586_v41 = vmul.f32 %v2570_v38, %v4100_v15  ;;  %v2511_v45 = vmul.f32 %v2503_v30, %v4078_v46  ;;  %v2550_v62 = vmul.f32 %v4094_v14, %v2537_v5 }
 0x2e4   :  { %v2415_v8 = vadd.f32 %v2407_v27, %v2363_v59  ;;  %v2572_v33 = vrot.slane %v2539_v31, 1  ;;  %v2552_v48 = vmul.f32 %v4094_v14, %v2539_v31 }
 0x2e5   :  { %v2530_v44 = vadd.f32 %v4092_v13, %v2517_v16  ;;  %v2594_v1 = vadd.f32 %v2586_v41, %v2550_v62 }
 0x2e6   :  { %v2467_v32 = vadd.f32 %v2459_v6, %v2415_v8  ;;  %v2588_v22 = vmul.f32 %v2572_v33, %v4100_v15 }
 0x2e7   :  { %v2538_v42 = vmax.f32 %v2530_v44, 0.0  ;;  %v2607_v29 = vadd.f32 %v4110_v0, %v2594_v1 }
 0x2e8   :  { %v2519_v34 = vadd.f32 %v2511_v45, %v2467_v32  ;;  %v2596_v21 = vadd.f32 %v2588_v22, %v2552_v48 }
 0x2e9   :  { %v2571_v18 = vrot.slane %v2538_v42, 1  ;;  %v2551_v60 = vmul.f32 %v4094_v14, %v2538_v42 }
 0x2ea   :  { %v2532_v49 = vadd.f32 %v4092_v13, %v2519_v34  ;;  %v2609_v50 = vadd.f32 %v4110_v0, %v2596_v21 }
 0x2eb   :  { %v2587_v12 = vmul.f32 %v2571_v18, %v4100_v15 }
 0x2ec   :  { %v2540_v11 = vmax.f32 %v2532_v49, 0.0 }
 0x2ed   :  { %v2595_v46 = vadd.f32 %v2587_v12, %v2551_v60 }
 0x2ee   :  { %v2573_v35 = vrot.slane %v2540_v11, 1  ;;  %v2553_v13 = vmul.f32 %v4094_v14, %v2540_v11 }
 0x2ef   :  { %v2608_v39 = vadd.f32 %v4110_v0, %v2595_v46 }
 0x2f0   :  { %v2589_v40 = vmul.f32 %v2573_v35, %v4100_v15  ;;  %v2659_v15 = vrot.slane %v2651_v20, %v4113_v4 }
 0x2f1   :  { %v2621_v43 = vcombine.low %v2607_v29, %v2608_v39 }
 0x2f2   :  { %v2597_v47 = vadd.f32 %v2589_v40, %v2553_v13 }
 0x2f3   :  { %v2643_v51 = vrot.slane %v2621_v43, %v4113_v4 }
 0x2f4   :  { %v2610_v52 = vadd.f32 %v4110_v0, %v2597_v47 }
 0x2f6   :  { %v2622_v55 = vcombine.low %v2609_v50, %v2610_v52 }
 0x2f8   :  { %v2650_v56 = vrot.slane %v2622_v55, %v4113_v4 }
 0x2fa   :  { %v2652_v37 = vcombine.low %v2643_v51, %v2650_v56 }
 0x2fc   :  { %v2666_v14 = vrot.slane %v2652_v37, %v4113_v4 }
 0x2fe   :  { %v2667_v17 = vcombine.low %v2659_v15, %v2666_v14 }
 0x300   :  { %2669 = vst [vmem:[#allocation2] sm:$0xff] %v2667_v17 }
 0x301   :  { %3201 = shalt.err (!%p3198_p4)
}
 0x302   :  { %s3202_s5 = scalar_lea.hbm %s4280_s4, 128 }
 0x303   :  { %p3203_p5 = scmp.ne.s32.totalorder %s4280_s4, %s3202_s5  ;;  %p3206_p6 = scmp.lt.u32.totalorder %s3202_s5, %s4280_s4 }
 0x305   :  { %p3208_p7 = pnand %p3206_p6, %p3203_p5 }
 0x307   :  { %3211 = shalt.err (!%p3208_p7)
}
 0x308   :  { %2679 = dma.vmem_to_hbm [thread:$0]  %s2677_s27, 128, %s4280_s4, [#allocation3]  }
 0x309   :  { %3212 = dma.done.wait [#allocation3], 128  }
 0x30a   :  { %3213 = vsyncadd [#allocation3], 4294967168 }
 0x30b   :  { %2683 = vsyncpa [#allocation3], 1 }

</bundles_post_ra>
